<compile_context>
chip_gen: v5e
topology: v5e:2x2
jax: 0.10.0
libtpu: 0.0.40
codegen_flags: <defaults>
</compile_context>

<pallas_src>
import math
import numpy as np
import jax
import jax.numpy as jnp
from jax.experimental import pallas as pl
from jax.experimental.pallas import tpu as pltpu


# ---------------------------------------------------------------------------
# Fused Pallas kernel (whole forward in one invocation, no grid)
# ---------------------------------------------------------------------------
def _make_fused_lstm_kernel(num_layers):
    """Build the fused kernel for `num_layers` stacked LSTM layers + Linear.

    Ref layout (all whole-array VMEM refs, single invocation):
      refs[0]                  x       (T*B, I)   time-major flattened input
      refs[1 + 3*l + 0]        W_ih^T  (I_l, 4H)  layer l
      refs[1 + 3*l + 1]        W_hh^T  (H, 4H)
      refs[1 + 3*l + 2]        bias    (1, 4H)    (= b_ih + b_hh)
      refs[1 + 3*L + 0]        h_0     (L, B, H)
      refs[1 + 3*L + 1]        c_0     (L, B, H)
      refs[1 + 3*L + 2]        W_lin^T (H, O)
      refs[1 + 3*L + 3]        b_lin   (1, O)
      refs[1 + 3*L + 4]        out     (B, O)     <- output
    """

    def kernel(*refs):
        x_ref = refs[0]
        layer_refs = refs[1:1 + 3 * num_layers]
        h0_ref, c0_ref, lin_w_ref, lin_b_ref, out_ref = refs[1 + 3 * num_layers:]

        L, B, H = h0_ref.shape
        T = x_ref.shape[0] // B

        # Lane mask selecting the "g" (cell-candidate) gate block, hoisted once
        # (JAX does not CSE broadcast_in_dim inside loops).
        lane = jax.lax.broadcasted_iota(jnp.int32, (B, 4 * H), 1)
        g_mask = (lane >= 2 * H) & (lane < 3 * H)

        def lstm_cell(gates, c):
            # Full-vreg activations + one lane-masked select.
            # PyTorch gate order: [i, f, g, o].
            act = jnp.where(g_mask, jnp.tanh(gates), jax.nn.sigmoid(gates))
            i_g = act[:, 0 * H:1 * H]
            f_g = act[:, 1 * H:2 * H]
            g_g = act[:, 2 * H:3 * H]
            o_g = act[:, 3 * H:4 * H]
            c_new = f_g * c + i_g * g_g
            h_new = o_g * jnp.tanh(c_new)
            return h_new, c_new

        # Load weights / states into values once.
        wih = [layer_refs[3 * l + 0][...] for l in range(num_layers)]
        whh = [layer_refs[3 * l + 1][...] for l in range(num_layers)]
        bias = [layer_refs[3 * l + 2][...] for l in range(num_layers)]
        h = [h0_ref[l] for l in range(num_layers)]
        c = [c0_ref[l] for l in range(num_layers)]

        # Hoisted layer-0 input projection: one MXU op for the whole sequence.
        xp0 = jnp.dot(x_ref[...], wih[0],
                      preferred_element_type=jnp.float32) + bias[0]     # (T*B, 4H)

        # Wavefront over (t, layer), statically unrolled (T and L are small &
        # fixed).  h/c are plain loop-carried values -> no HBM round trips.
        for t in range(T):
            for l in range(num_layers):
                if l == 0:
                    gates = xp0[t * B:(t + 1) * B, :] + jnp.dot(
                        h[0], whh[0], preferred_element_type=jnp.float32)
                else:
                    gates = (jnp.dot(h[l - 1], wih[l],
                                     preferred_element_type=jnp.float32)
                             + jnp.dot(h[l], whh[l],
                                       preferred_element_type=jnp.float32)
                             + bias[l])
                h[l], c[l] = lstm_cell(gates, c[l])

        # Linear head on the last timestep of the top layer only
        # (identical to projecting all steps and taking [:, -1, :]).
        out_ref[...] = (jnp.dot(h[num_layers - 1], lin_w_ref[...],
                                preferred_element_type=jnp.float32)
                        + lin_b_ref[...])

    return kernel


# ---------------------------------------------------------------------------
# Wrapper (mirrors LSTM.forward of the PyTorch module)
# ---------------------------------------------------------------------------
def lstm_model_forward(params, input_seq, h_0, c_0):
    """input_seq: (B, T, I) batch-first; h_0/c_0: (num_layers, B, H).

    Returns (B, output_size): Linear head applied to the last timestep.
    """
    B, T, I = input_seq.shape
    L = len(params["lstm"])
    O = params["lin_w_t"].shape[-1]

    # Time-major flatten so each timestep is a contiguous, 8-sublane-aligned row
    # block inside the kernel (one whole-slab DMA instead of T tiny padded ones).
    x_flat = jnp.transpose(input_seq, (1, 0, 2)).reshape(T * B, I)

    args = [x_flat]
    for p in params["lstm"]:
        args += [p["wih_t"], p["whh_t"], p["bias"]]
    args += [h_0, c_0, params["lin_w_t"], params["lin_b"]]

    vmem = pl.BlockSpec(memory_space=pltpu.MemorySpace.VMEM)
    return pl.pallas_call(
        _make_fused_lstm_kernel(L),
        out_shape=jax.ShapeDtypeStruct((B, O), jnp.float32),
        in_specs=[vmem] * len(args),
        out_specs=vmem,
    )(*args)


lstm_model_forward_jit = jax.jit(lstm_model_forward)


# ---------------------------------------------------------------------------
# Pure-JAX reference (for correctness check)
# ---------------------------------------------------------------------------
def lstm_model_reference(params, input_seq, h_0, c_0):
    B, T, I = input_seq.shape
    H = h_0.shape[-1]
    x = jnp.transpose(input_seq, (1, 0, 2))
    for layer, p in enumerate(params["lstm"]):

        def step(carry, x_t, p=p, H=H):
            h, c = carry
            gates = x_t @ p["wih_t"] + h @ p["whh_t"] + p["bias"]
            i = jax.nn.sigmoid(gates[:, 0 * H:1 * H])
            f = jax.nn.sigmoid(gates[:, 1 * H:2 * H])
            g = jnp.tanh(gates[:, 2 * H:3 * H])
            o = jax.nn.sigmoid(gates[:, 3 * H:4 * H])
            c_new = f * c + i * g
            h_new = o * jnp.tanh(c_new)
            return (h_new, c_new), h_new

        (_, _), hs = jax.lax.scan(step, (h_0[layer], c_0[layer]), x)
        x = hs
    output = jnp.transpose(x, (1, 0, 2))
    flat = output.reshape(B * T, H)
    pred = flat @ params["lin_w_t"] + params["lin_b"]
    pred = pred.reshape(B, T, -1)
    return pred[:, -1, :]


# ---------------------------------------------------------------------------
# Deterministic parameter init (matches nn.LSTM / nn.Linear shapes & init range)
# ---------------------------------------------------------------------------
def init_params(key, input_size, hidden_size, num_layers, output_size):
    params = {"lstm": []}
    k_lstm = 1.0 / math.sqrt(hidden_size)
    for layer in range(num_layers):
        in_sz = input_size if layer == 0 else hidden_size
        key, k1, k2, k3, k4 = jax.random.split(key, 5)
        w_ih = jax.random.uniform(k1, (4 * hidden_size, in_sz),
                                  minval=-k_lstm, maxval=k_lstm, dtype=jnp.float32)
        w_hh = jax.random.uniform(k2, (4 * hidden_size, hidden_size),
                                  minval=-k_lstm, maxval=k_lstm, dtype=jnp.float32)
        b_ih = jax.random.uniform(k3, (4 * hidden_size,),
                                  minval=-k_lstm, maxval=k_lstm, dtype=jnp.float32)
        b_hh = jax.random.uniform(k4, (4 * hidden_size,),
                                  minval=-k_lstm, maxval=k_lstm, dtype=jnp.float32)
        params["lstm"].append({
            "wih_t": w_ih.T,                    # (in_sz, 4H)
            "whh_t": w_hh.T,                    # (H, 4H)
            "bias": (b_ih + b_hh)[None, :],     # (1, 4H)
        })
    key, k5, k6 = jax.random.split(key, 3)
    k_lin = 1.0 / math.sqrt(hidden_size)
    lin_w = jax.random.uniform(k5, (output_size, hidden_size),
                               minval=-k_lin, maxval=k_lin, dtype=jnp.float32)
    lin_b = jax.random.uniform(k6, (output_size,),
                               minval=-k_lin, maxval=k_lin, dtype=jnp.float32)
    params["lin_w_t"] = lin_w.T                 # (H, O)
    params["lin_b"] = lin_b[None, :]            # (1, O)
    return params, key


# ---------------------------------------------------------------------------
if __name__ == "__main__":
    # Model config (input_size=50 is hard-coded in the PyTorch forward via ipt_size).
    input_size = 50
    hidden_size = 32
    num_layers = 2
    output_size = 4
    batch_size = 8
    seq_len = 6

    root = jax.random.PRNGKey(0)
    params, root = init_params(root, input_size, hidden_size, num_layers, output_size)

    root, kx, kh, kc = jax.random.split(root, 4)
    input_seq = jax.random.normal(kx, (batch_size, seq_len, input_size), dtype=jnp.float32)
    # TODO(synk): PyTorch draws h_0/c_0 with torch.randn inside forward; here they
    # are deterministic explicit inputs.
    h_0 = jax.random.normal(kh, (num_layers, batch_size, hidden_size), dtype=jnp.float32)
    c_0 = jax.random.normal(kc, (num_layers, batch_size, hidden_size), dtype=jnp.float32)

    pred = lstm_model_forward_jit(params, input_seq, h_0, c_0)
    pred = jax.block_until_ready(pred)

    ref = jax.block_until_ready(lstm_model_reference(params, input_seq, h_0, c_0))
    assert pred.shape == (batch_size, output_size)
    np.testing.assert_allclose(np.asarray(pred), np.asarray(ref), atol=2e-3, rtol=2e-3)

    print("KERNEL_OK")
</pallas_src>

<mosaic_0001>
module attributes {stable_mosaic.version = 11 : i64} {
  func.func @kernel(%arg0: memref<48x50xf32, #tpu.memory_space<vmem>>, %arg1: memref<50x128xf32, #tpu.memory_space<vmem>>, %arg2: memref<32x128xf32, #tpu.memory_space<vmem>>, %arg3: memref<1x128xf32, #tpu.memory_space<vmem>>, %arg4: memref<32x128xf32, #tpu.memory_space<vmem>>, %arg5: memref<32x128xf32, #tpu.memory_space<vmem>>, %arg6: memref<1x128xf32, #tpu.memory_space<vmem>>, %arg7: memref<2x8x32xf32, #tpu.memory_space<vmem>>, %arg8: memref<2x8x32xf32, #tpu.memory_space<vmem>>, %arg9: memref<32x4xf32, #tpu.memory_space<vmem>>, %arg10: memref<1x4xf32, #tpu.memory_space<vmem>>, %arg11: memref<8x4xf32, #tpu.memory_space<vmem>>) attributes {dimension_semantics = [], scalar_prefetch = 0 : i64, scratch_operands = 0 : i64, tpu.core_type = #tpu.core_type<tc>} {
    %0 = tpu.iota {dimensions = array<i32: 1>} : vector<8x128xi32>
    %c64_i32 = arith.constant 64 : i32
    %1 = vector.broadcast %c64_i32 : i32 to vector<8x128xi32>
    %2 = arith.cmpi sge, %0, %1 : vector<8x128xi32>
    %c96_i32 = arith.constant 96 : i32
    %3 = vector.broadcast %c96_i32 : i32 to vector<8x128xi32>
    %4 = arith.cmpi slt, %0, %3 : vector<8x128xi32>
    %5 = arith.andi %2, %4 : vector<8x128xi1>
    %c0 = arith.constant 0 : index
    %c0_0 = arith.constant 0 : index
    %6 = vector.load %arg1[%c0, %c0_0] : memref<50x128xf32, #tpu.memory_space<vmem>>, vector<50x128xf32>
    %c0_1 = arith.constant 0 : index
    %c0_2 = arith.constant 0 : index
    %7 = vector.load %arg4[%c0_1, %c0_2] : memref<32x128xf32, #tpu.memory_space<vmem>>, vector<32x128xf32>
    %c0_3 = arith.constant 0 : index
    %c0_4 = arith.constant 0 : index
    %8 = vector.load %arg2[%c0_3, %c0_4] : memref<32x128xf32, #tpu.memory_space<vmem>>, vector<32x128xf32>
    %c0_5 = arith.constant 0 : index
    %c0_6 = arith.constant 0 : index
    %9 = vector.load %arg5[%c0_5, %c0_6] : memref<32x128xf32, #tpu.memory_space<vmem>>, vector<32x128xf32>
    %c0_7 = arith.constant 0 : index
    %c0_8 = arith.constant 0 : index
    %10 = vector.load %arg3[%c0_7, %c0_8] : memref<1x128xf32, #tpu.memory_space<vmem>>, vector<1x128xf32>
    %c0_9 = arith.constant 0 : index
    %c0_10 = arith.constant 0 : index
    %11 = vector.load %arg6[%c0_9, %c0_10] : memref<1x128xf32, #tpu.memory_space<vmem>>, vector<1x128xf32>
    %c0_11 = arith.constant 0 : index
    %c0_12 = arith.constant 0 : index
    %c0_13 = arith.constant 0 : index
    %12 = vector.load %arg7[%c0_11, %c0_12, %c0_13] : memref<2x8x32xf32, #tpu.memory_space<vmem>>, vector<1x8x32xf32>
    %13 = vector.shape_cast %12 : vector<1x8x32xf32> to vector<8x32xf32>
    %c1 = arith.constant 1 : index
    %c0_14 = arith.constant 0 : index
    %c0_15 = arith.constant 0 : index
    %14 = vector.load %arg7[%c1, %c0_14, %c0_15] : memref<2x8x32xf32, #tpu.memory_space<vmem>>, vector<1x8x32xf32>
    %15 = vector.shape_cast %14 : vector<1x8x32xf32> to vector<8x32xf32>
    %c0_16 = arith.constant 0 : index
    %c0_17 = arith.constant 0 : index
    %c0_18 = arith.constant 0 : index
    %16 = vector.load %arg8[%c0_16, %c0_17, %c0_18] : memref<2x8x32xf32, #tpu.memory_space<vmem>>, vector<1x8x32xf32>
    %17 = vector.shape_cast %16 : vector<1x8x32xf32> to vector<8x32xf32>
    %c1_19 = arith.constant 1 : index
    %c0_20 = arith.constant 0 : index
    %c0_21 = arith.constant 0 : index
    %18 = vector.load %arg8[%c1_19, %c0_20, %c0_21] : memref<2x8x32xf32, #tpu.memory_space<vmem>>, vector<1x8x32xf32>
    %19 = vector.shape_cast %18 : vector<1x8x32xf32> to vector<8x32xf32>
    %c0_22 = arith.constant 0 : index
    %c0_23 = arith.constant 0 : index
    %20 = vector.load %arg0[%c0_22, %c0_23] : memref<48x50xf32, #tpu.memory_space<vmem>>, vector<48x50xf32>
    %cst = arith.constant dense<0.000000e+00> : vector<48x128xf32>
    %21 = tpu.matmul %20, %6, %cst {dimension_numbers = #tpu.dot_dimension_numbers<[1], [0], [0], [1], [0, 0, 1, 1], [], []>} : vector<48x50xf32>, vector<50x128xf32>, vector<48x128xf32> -> vector<48x128xf32>
    %22 = vector.broadcast %10 : vector<1x128xf32> to vector<48x128xf32>
    %23 = arith.addf %21, %22 : vector<48x128xf32>
    %24 = vector.extract_strided_slice %23 {offsets = [0, 0], sizes = [8, 128], strides = [1, 1]} : vector<48x128xf32> to vector<8x128xf32>
    %cst_24 = arith.constant dense<0.000000e+00> : vector<8x128xf32>
    %25 = tpu.matmul %13, %8, %cst_24 {dimension_numbers = #tpu.dot_dimension_numbers<[1], [0], [0], [1], [0, 0, 1, 1], [], []>} : vector<8x32xf32>, vector<32x128xf32>, vector<8x128xf32> -> vector<8x128xf32>
    %26 = arith.addf %24, %25 : vector<8x128xf32>
    %27 = math.tanh %26 : vector<8x128xf32>
    %28 = arith.negf %26 : vector<8x128xf32>
    %29 = math.exp %28 : vector<8x128xf32>
    %cst_25 = arith.constant 1.000000e+00 : f32
    %30 = vector.broadcast %cst_25 : f32 to vector<8x128xf32>
    %31 = arith.addf %30, %29 : vector<8x128xf32>
    %32 = arith.divf %30, %31 : vector<8x128xf32>
    %33 = arith.select %5, %27, %32 : vector<8x128xi1>, vector<8x128xf32>
    %34 = vector.extract_strided_slice %33 {offsets = [0, 0], sizes = [8, 32], strides = [1, 1]} : vector<8x128xf32> to vector<8x32xf32>
    %35 = vector.extract_strided_slice %33 {offsets = [0, 32], sizes = [8, 32], strides = [1, 1]} : vector<8x128xf32> to vector<8x32xf32>
    %36 = vector.extract_strided_slice %33 {offsets = [0, 64], sizes = [8, 32], strides = [1, 1]} : vector<8x128xf32> to vector<8x32xf32>
    %37 = vector.extract_strided_slice %33 {offsets = [0, 96], sizes = [8, 32], strides = [1, 1]} : vector<8x128xf32> to vector<8x32xf32>
    %38 = arith.mulf %35, %17 : vector<8x32xf32>
    %39 = arith.mulf %34, %36 : vector<8x32xf32>
    %40 = arith.addf %38, %39 : vector<8x32xf32>
    %41 = math.tanh %40 : vector<8x32xf32>
    %42 = arith.mulf %37, %41 : vector<8x32xf32>
    %cst_26 = arith.constant dense<0.000000e+00> : vector<8x128xf32>
    %43 = tpu.matmul %42, %7, %cst_26 {dimension_numbers = #tpu.dot_dimension_numbers<[1], [0], [0], [1], [0, 0, 1, 1], [], []>} : vector<8x32xf32>, vector<32x128xf32>, vector<8x128xf32> -> vector<8x128xf32>
    %cst_27 = arith.constant dense<0.000000e+00> : vector<8x128xf32>
    %44 = tpu.matmul %15, %9, %cst_27 {dimension_numbers = #tpu.dot_dimension_numbers<[1], [0], [0], [1], [0, 0, 1, 1], [], []>} : vector<8x32xf32>, vector<32x128xf32>, vector<8x128xf32> -> vector<8x128xf32>
    %45 = arith.addf %43, %44 : vector<8x128xf32>
    %46 = vector.broadcast %11 : vector<1x128xf32> to vector<8x128xf32>
    %47 = arith.addf %45, %46 : vector<8x128xf32>
    %48 = math.tanh %47 : vector<8x128xf32>
    %49 = arith.negf %47 : vector<8x128xf32>
    %50 = math.exp %49 : vector<8x128xf32>
    %cst_28 = arith.constant 1.000000e+00 : f32
    %51 = vector.broadcast %cst_28 : f32 to vector<8x128xf32>
    %52 = arith.addf %51, %50 : vector<8x128xf32>
    %53 = arith.divf %51, %52 : vector<8x128xf32>
    %54 = arith.select %5, %48, %53 : vector<8x128xi1>, vector<8x128xf32>
    %55 = vector.extract_strided_slice %54 {offsets = [0, 0], sizes = [8, 32], strides = [1, 1]} : vector<8x128xf32> to vector<8x32xf32>
    %56 = vector.extract_strided_slice %54 {offsets = [0, 32], sizes = [8, 32], strides = [1, 1]} : vector<8x128xf32> to vector<8x32xf32>
    %57 = vector.extract_strided_slice %54 {offsets = [0, 64], sizes = [8, 32], strides = [1, 1]} : vector<8x128xf32> to vector<8x32xf32>
    %58 = vector.extract_strided_slice %54 {offsets = [0, 96], sizes = [8, 32], strides = [1, 1]} : vector<8x128xf32> to vector<8x32xf32>
    %59 = arith.mulf %56, %19 : vector<8x32xf32>
    %60 = arith.mulf %55, %57 : vector<8x32xf32>
    %61 = arith.addf %59, %60 : vector<8x32xf32>
    %62 = math.tanh %61 : vector<8x32xf32>
    %63 = arith.mulf %58, %62 : vector<8x32xf32>
    %64 = vector.extract_strided_slice %23 {offsets = [8, 0], sizes = [8, 128], strides = [1, 1]} : vector<48x128xf32> to vector<8x128xf32>
    %cst_29 = arith.constant dense<0.000000e+00> : vector<8x128xf32>
    %65 = tpu.matmul %42, %8, %cst_29 {dimension_numbers = #tpu.dot_dimension_numbers<[1], [0], [0], [1], [0, 0, 1, 1], [], []>} : vector<8x32xf32>, vector<32x128xf32>, vector<8x128xf32> -> vector<8x128xf32>
    %66 = arith.addf %64, %65 : vector<8x128xf32>
    %67 = math.tanh %66 : vector<8x128xf32>
    %68 = arith.negf %66 : vector<8x128xf32>
    %69 = math.exp %68 : vector<8x128xf32>
    %cst_30 = arith.constant 1.000000e+00 : f32
    %70 = vector.broadcast %cst_30 : f32 to vector<8x128xf32>
    %71 = arith.addf %70, %69 : vector<8x128xf32>
    %72 = arith.divf %70, %71 : vector<8x128xf32>
    %73 = arith.select %5, %67, %72 : vector<8x128xi1>, vector<8x128xf32>
    %74 = vector.extract_strided_slice %73 {offsets = [0, 0], sizes = [8, 32], strides = [1, 1]} : vector<8x128xf32> to vector<8x32xf32>
    %75 = vector.extract_strided_slice %73 {offsets = [0, 32], sizes = [8, 32], strides = [1, 1]} : vector<8x128xf32> to vector<8x32xf32>
    %76 = vector.extract_strided_slice %73 {offsets = [0, 64], sizes = [8, 32], strides = [1, 1]} : vector<8x128xf32> to vector<8x32xf32>
    %77 = vector.extract_strided_slice %73 {offsets = [0, 96], sizes = [8, 32], strides = [1, 1]} : vector<8x128xf32> to vector<8x32xf32>
    %78 = arith.mulf %75, %40 : vector<8x32xf32>
    %79 = arith.mulf %74, %76 : vector<8x32xf32>
    %80 = arith.addf %78, %79 : vector<8x32xf32>
    %81 = math.tanh %80 : vector<8x32xf32>
    %82 = arith.mulf %77, %81 : vector<8x32xf32>
    %cst_31 = arith.constant dense<0.000000e+00> : vector<8x128xf32>
    %83 = tpu.matmul %82, %7, %cst_31 {dimension_numbers = #tpu.dot_dimension_numbers<[1], [0], [0], [1], [0, 0, 1, 1], [], []>} : vector<8x32xf32>, vector<32x128xf32>, vector<8x128xf32> -> vector<8x128xf32>
    %cst_32 = arith.constant dense<0.000000e+00> : vector<8x128xf32>
    %84 = tpu.matmul %63, %9, %cst_32 {dimension_numbers = #tpu.dot_dimension_numbers<[1], [0], [0], [1], [0, 0, 1, 1], [], []>} : vector<8x32xf32>, vector<32x128xf32>, vector<8x128xf32> -> vector<8x128xf32>
    %85 = arith.addf %83, %84 : vector<8x128xf32>
    %86 = vector.broadcast %11 : vector<1x128xf32> to vector<8x128xf32>
    %87 = arith.addf %85, %86 : vector<8x128xf32>
    %88 = math.tanh %87 : vector<8x128xf32>
    %89 = arith.negf %87 : vector<8x128xf32>
    %90 = math.exp %89 : vector<8x128xf32>
    %cst_33 = arith.constant 1.000000e+00 : f32
    %91 = vector.broadcast %cst_33 : f32 to vector<8x128xf32>
    %92 = arith.addf %91, %90 : vector<8x128xf32>
    %93 = arith.divf %91, %92 : vector<8x128xf32>
    %94 = arith.select %5, %88, %93 : vector<8x128xi1>, vector<8x128xf32>
    %95 = vector.extract_strided_slice %94 {offsets = [0, 0], sizes = [8, 32], strides = [1, 1]} : vector<8x128xf32> to vector<8x32xf32>
    %96 = vector.extract_strided_slice %94 {offsets = [0, 32], sizes = [8, 32], strides = [1, 1]} : vector<8x128xf32> to vector<8x32xf32>
    %97 = vector.extract_strided_slice %94 {offsets = [0, 64], sizes = [8, 32], strides = [1, 1]} : vector<8x128xf32> to vector<8x32xf32>
    %98 = vector.extract_strided_slice %94 {offsets = [0, 96], sizes = [8, 32], strides = [1, 1]} : vector<8x128xf32> to vector<8x32xf32>
    %99 = arith.mulf %96, %61 : vector<8x32xf32>
    %100 = arith.mulf %95, %97 : vector<8x32xf32>
    %101 = arith.addf %99, %100 : vector<8x32xf32>
    %102 = math.tanh %101 : vector<8x32xf32>
    %103 = arith.mulf %98, %102 : vector<8x32xf32>
    %104 = vector.extract_strided_slice %23 {offsets = [16, 0], sizes = [8, 128], strides = [1, 1]} : vector<48x128xf32> to vector<8x128xf32>
    %cst_34 = arith.constant dense<0.000000e+00> : vector<8x128xf32>
    %105 = tpu.matmul %82, %8, %cst_34 {dimension_numbers = #tpu.dot_dimension_numbers<[1], [0], [0], [1], [0, 0, 1, 1], [], []>} : vector<8x32xf32>, vector<32x128xf32>, vector<8x128xf32> -> vector<8x128xf32>
    %106 = arith.addf %104, %105 : vector<8x128xf32>
    %107 = math.tanh %106 : vector<8x128xf32>
    %108 = arith.negf %106 : vector<8x128xf32>
    %109 = math.exp %108 : vector<8x128xf32>
    %cst_35 = arith.constant 1.000000e+00 : f32
    %110 = vector.broadcast %cst_35 : f32 to vector<8x128xf32>
    %111 = arith.addf %110, %109 : vector<8x128xf32>
    %112 = arith.divf %110, %111 : vector<8x128xf32>
    %113 = arith.select %5, %107, %112 : vector<8x128xi1>, vector<8x128xf32>
    %114 = vector.extract_strided_slice %113 {offsets = [0, 0], sizes = [8, 32], strides = [1, 1]} : vector<8x128xf32> to vector<8x32xf32>
    %115 = vector.extract_strided_slice %113 {offsets = [0, 32], sizes = [8, 32], strides = [1, 1]} : vector<8x128xf32> to vector<8x32xf32>
    %116 = vector.extract_strided_slice %113 {offsets = [0, 64], sizes = [8, 32], strides = [1, 1]} : vector<8x128xf32> to vector<8x32xf32>
    %117 = vector.extract_strided_slice %113 {offsets = [0, 96], sizes = [8, 32], strides = [1, 1]} : vector<8x128xf32> to vector<8x32xf32>
    %118 = arith.mulf %115, %80 : vector<8x32xf32>
    %119 = arith.mulf %114, %116 : vector<8x32xf32>
    %120 = arith.addf %118, %119 : vector<8x32xf32>
    %121 = math.tanh %120 : vector<8x32xf32>
    %122 = arith.mulf %117, %121 : vector<8x32xf32>
    %cst_36 = arith.constant dense<0.000000e+00> : vector<8x128xf32>
    %123 = tpu.matmul %122, %7, %cst_36 {dimension_numbers = #tpu.dot_dimension_numbers<[1], [0], [0], [1], [0, 0, 1, 1], [], []>} : vector<8x32xf32>, vector<32x128xf32>, vector<8x128xf32> -> vector<8x128xf32>
    %cst_37 = arith.constant dense<0.000000e+00> : vector<8x128xf32>
    %124 = tpu.matmul %103, %9, %cst_37 {dimension_numbers = #tpu.dot_dimension_numbers<[1], [0], [0], [1], [0, 0, 1, 1], [], []>} : vector<8x32xf32>, vector<32x128xf32>, vector<8x128xf32> -> vector<8x128xf32>
    %125 = arith.addf %123, %124 : vector<8x128xf32>
    %126 = vector.broadcast %11 : vector<1x128xf32> to vector<8x128xf32>
    %127 = arith.addf %125, %126 : vector<8x128xf32>
    %128 = math.tanh %127 : vector<8x128xf32>
    %129 = arith.negf %127 : vector<8x128xf32>
    %130 = math.exp %129 : vector<8x128xf32>
    %cst_38 = arith.constant 1.000000e+00 : f32
    %131 = vector.broadcast %cst_38 : f32 to vector<8x128xf32>
    %132 = arith.addf %131, %130 : vector<8x128xf32>
    %133 = arith.divf %131, %132 : vector<8x128xf32>
    %134 = arith.select %5, %128, %133 : vector<8x128xi1>, vector<8x128xf32>
    %135 = vector.extract_strided_slice %134 {offsets = [0, 0], sizes = [8, 32], strides = [1, 1]} : vector<8x128xf32> to vector<8x32xf32>
    %136 = vector.extract_strided_slice %134 {offsets = [0, 32], sizes = [8, 32], strides = [1, 1]} : vector<8x128xf32> to vector<8x32xf32>
    %137 = vector.extract_strided_slice %134 {offsets = [0, 64], sizes = [8, 32], strides = [1, 1]} : vector<8x128xf32> to vector<8x32xf32>
    %138 = vector.extract_strided_slice %134 {offsets = [0, 96], sizes = [8, 32], strides = [1, 1]} : vector<8x128xf32> to vector<8x32xf32>
    %139 = arith.mulf %136, %101 : vector<8x32xf32>
    %140 = arith.mulf %135, %137 : vector<8x32xf32>
    %141 = arith.addf %139, %140 : vector<8x32xf32>
    %142 = math.tanh %141 : vector<8x32xf32>
    %143 = arith.mulf %138, %142 : vector<8x32xf32>
    %144 = vector.extract_strided_slice %23 {offsets = [24, 0], sizes = [8, 128], strides = [1, 1]} : vector<48x128xf32> to vector<8x128xf32>
    %cst_39 = arith.constant dense<0.000000e+00> : vector<8x128xf32>
    %145 = tpu.matmul %122, %8, %cst_39 {dimension_numbers = #tpu.dot_dimension_numbers<[1], [0], [0], [1], [0, 0, 1, 1], [], []>} : vector<8x32xf32>, vector<32x128xf32>, vector<8x128xf32> -> vector<8x128xf32>
    %146 = arith.addf %144, %145 : vector<8x128xf32>
    %147 = math.tanh %146 : vector<8x128xf32>
    %148 = arith.negf %146 : vector<8x128xf32>
    %149 = math.exp %148 : vector<8x128xf32>
    %cst_40 = arith.constant 1.000000e+00 : f32
    %150 = vector.broadcast %cst_40 : f32 to vector<8x128xf32>
    %151 = arith.addf %150, %149 : vector<8x128xf32>
    %152 = arith.divf %150, %151 : vector<8x128xf32>
    %153 = arith.select %5, %147, %152 : vector<8x128xi1>, vector<8x128xf32>
    %154 = vector.extract_strided_slice %153 {offsets = [0, 0], sizes = [8, 32], strides = [1, 1]} : vector<8x128xf32> to vector<8x32xf32>
    %155 = vector.extract_strided_slice %153 {offsets = [0, 32], sizes = [8, 32], strides = [1, 1]} : vector<8x128xf32> to vector<8x32xf32>
    %156 = vector.extract_strided_slice %153 {offsets = [0, 64], sizes = [8, 32], strides = [1, 1]} : vector<8x128xf32> to vector<8x32xf32>
    %157 = vector.extract_strided_slice %153 {offsets = [0, 96], sizes = [8, 32], strides = [1, 1]} : vector<8x128xf32> to vector<8x32xf32>
    %158 = arith.mulf %155, %120 : vector<8x32xf32>
    %159 = arith.mulf %154, %156 : vector<8x32xf32>
    %160 = arith.addf %158, %159 : vector<8x32xf32>
    %161 = math.tanh %160 : vector<8x32xf32>
    %162 = arith.mulf %157, %161 : vector<8x32xf32>
    %cst_41 = arith.constant dense<0.000000e+00> : vector<8x128xf32>
    %163 = tpu.matmul %162, %7, %cst_41 {dimension_numbers = #tpu.dot_dimension_numbers<[1], [0], [0], [1], [0, 0, 1, 1], [], []>} : vector<8x32xf32>, vector<32x128xf32>, vector<8x128xf32> -> vector<8x128xf32>
    %cst_42 = arith.constant dense<0.000000e+00> : vector<8x128xf32>
    %164 = tpu.matmul %143, %9, %cst_42 {dimension_numbers = #tpu.dot_dimension_numbers<[1], [0], [0], [1], [0, 0, 1, 1], [], []>} : vector<8x32xf32>, vector<32x128xf32>, vector<8x128xf32> -> vector<8x128xf32>
    %165 = arith.addf %163, %164 : vector<8x128xf32>
    %166 = vector.broadcast %11 : vector<1x128xf32> to vector<8x128xf32>
    %167 = arith.addf %165, %166 : vector<8x128xf32>
    %168 = math.tanh %167 : vector<8x128xf32>
    %169 = arith.negf %167 : vector<8x128xf32>
    %170 = math.exp %169 : vector<8x128xf32>
    %cst_43 = arith.constant 1.000000e+00 : f32
    %171 = vector.broadcast %cst_43 : f32 to vector<8x128xf32>
    %172 = arith.addf %171, %170 : vector<8x128xf32>
    %173 = arith.divf %171, %172 : vector<8x128xf32>
    %174 = arith.select %5, %168, %173 : vector<8x128xi1>, vector<8x128xf32>
    %175 = vector.extract_strided_slice %174 {offsets = [0, 0], sizes = [8, 32], strides = [1, 1]} : vector<8x128xf32> to vector<8x32xf32>
    %176 = vector.extract_strided_slice %174 {offsets = [0, 32], sizes = [8, 32], strides = [1, 1]} : vector<8x128xf32> to vector<8x32xf32>
    %177 = vector.extract_strided_slice %174 {offsets = [0, 64], sizes = [8, 32], strides = [1, 1]} : vector<8x128xf32> to vector<8x32xf32>
    %178 = vector.extract_strided_slice %174 {offsets = [0, 96], sizes = [8, 32], strides = [1, 1]} : vector<8x128xf32> to vector<8x32xf32>
    %179 = arith.mulf %176, %141 : vector<8x32xf32>
    %180 = arith.mulf %175, %177 : vector<8x32xf32>
    %181 = arith.addf %179, %180 : vector<8x32xf32>
    %182 = math.tanh %181 : vector<8x32xf32>
    %183 = arith.mulf %178, %182 : vector<8x32xf32>
    %184 = vector.extract_strided_slice %23 {offsets = [32, 0], sizes = [8, 128], strides = [1, 1]} : vector<48x128xf32> to vector<8x128xf32>
    %cst_44 = arith.constant dense<0.000000e+00> : vector<8x128xf32>
    %185 = tpu.matmul %162, %8, %cst_44 {dimension_numbers = #tpu.dot_dimension_numbers<[1], [0], [0], [1], [0, 0, 1, 1], [], []>} : vector<8x32xf32>, vector<32x128xf32>, vector<8x128xf32> -> vector<8x128xf32>
    %186 = arith.addf %184, %185 : vector<8x128xf32>
    %187 = math.tanh %186 : vector<8x128xf32>
    %188 = arith.negf %186 : vector<8x128xf32>
    %189 = math.exp %188 : vector<8x128xf32>
    %cst_45 = arith.constant 1.000000e+00 : f32
    %190 = vector.broadcast %cst_45 : f32 to vector<8x128xf32>
    %191 = arith.addf %190, %189 : vector<8x128xf32>
    %192 = arith.divf %190, %191 : vector<8x128xf32>
    %193 = arith.select %5, %187, %192 : vector<8x128xi1>, vector<8x128xf32>
    %194 = vector.extract_strided_slice %193 {offsets = [0, 0], sizes = [8, 32], strides = [1, 1]} : vector<8x128xf32> to vector<8x32xf32>
    %195 = vector.extract_strided_slice %193 {offsets = [0, 32], sizes = [8, 32], strides = [1, 1]} : vector<8x128xf32> to vector<8x32xf32>
    %196 = vector.extract_strided_slice %193 {offsets = [0, 64], sizes = [8, 32], strides = [1, 1]} : vector<8x128xf32> to vector<8x32xf32>
    %197 = vector.extract_strided_slice %193 {offsets = [0, 96], sizes = [8, 32], strides = [1, 1]} : vector<8x128xf32> to vector<8x32xf32>
    %198 = arith.mulf %195, %160 : vector<8x32xf32>
    %199 = arith.mulf %194, %196 : vector<8x32xf32>
    %200 = arith.addf %198, %199 : vector<8x32xf32>
    %201 = math.tanh %200 : vector<8x32xf32>
    %202 = arith.mulf %197, %201 : vector<8x32xf32>
    %cst_46 = arith.constant dense<0.000000e+00> : vector<8x128xf32>
    %203 = tpu.matmul %202, %7, %cst_46 {dimension_numbers = #tpu.dot_dimension_numbers<[1], [0], [0], [1], [0, 0, 1, 1], [], []>} : vector<8x32xf32>, vector<32x128xf32>, vector<8x128xf32> -> vector<8x128xf32>
    %cst_47 = arith.constant dense<0.000000e+00> : vector<8x128xf32>
    %204 = tpu.matmul %183, %9, %cst_47 {dimension_numbers = #tpu.dot_dimension_numbers<[1], [0], [0], [1], [0, 0, 1, 1], [], []>} : vector<8x32xf32>, vector<32x128xf32>, vector<8x128xf32> -> vector<8x128xf32>
    %205 = arith.addf %203, %204 : vector<8x128xf32>
    %206 = vector.broadcast %11 : vector<1x128xf32> to vector<8x128xf32>
    %207 = arith.addf %205, %206 : vector<8x128xf32>
    %208 = math.tanh %207 : vector<8x128xf32>
    %209 = arith.negf %207 : vector<8x128xf32>
    %210 = math.exp %209 : vector<8x128xf32>
    %cst_48 = arith.constant 1.000000e+00 : f32
    %211 = vector.broadcast %cst_48 : f32 to vector<8x128xf32>
    %212 = arith.addf %211, %210 : vector<8x128xf32>
    %213 = arith.divf %211, %212 : vector<8x128xf32>
    %214 = arith.select %5, %208, %213 : vector<8x128xi1>, vector<8x128xf32>
    %215 = vector.extract_strided_slice %214 {offsets = [0, 0], sizes = [8, 32], strides = [1, 1]} : vector<8x128xf32> to vector<8x32xf32>
    %216 = vector.extract_strided_slice %214 {offsets = [0, 32], sizes = [8, 32], strides = [1, 1]} : vector<8x128xf32> to vector<8x32xf32>
    %217 = vector.extract_strided_slice %214 {offsets = [0, 64], sizes = [8, 32], strides = [1, 1]} : vector<8x128xf32> to vector<8x32xf32>
    %218 = vector.extract_strided_slice %214 {offsets = [0, 96], sizes = [8, 32], strides = [1, 1]} : vector<8x128xf32> to vector<8x32xf32>
    %219 = arith.mulf %216, %181 : vector<8x32xf32>
    %220 = arith.mulf %215, %217 : vector<8x32xf32>
    %221 = arith.addf %219, %220 : vector<8x32xf32>
    %222 = math.tanh %221 : vector<8x32xf32>
    %223 = arith.mulf %218, %222 : vector<8x32xf32>
    %224 = vector.extract_strided_slice %23 {offsets = [40, 0], sizes = [8, 128], strides = [1, 1]} : vector<48x128xf32> to vector<8x128xf32>
    %cst_49 = arith.constant dense<0.000000e+00> : vector<8x128xf32>
    %225 = tpu.matmul %202, %8, %cst_49 {dimension_numbers = #tpu.dot_dimension_numbers<[1], [0], [0], [1], [0, 0, 1, 1], [], []>} : vector<8x32xf32>, vector<32x128xf32>, vector<8x128xf32> -> vector<8x128xf32>
    %226 = arith.addf %224, %225 : vector<8x128xf32>
    %227 = math.tanh %226 : vector<8x128xf32>
    %228 = arith.negf %226 : vector<8x128xf32>
    %229 = math.exp %228 : vector<8x128xf32>
    %cst_50 = arith.constant 1.000000e+00 : f32
    %230 = vector.broadcast %cst_50 : f32 to vector<8x128xf32>
    %231 = arith.addf %230, %229 : vector<8x128xf32>
    %232 = arith.divf %230, %231 : vector<8x128xf32>
    %233 = arith.select %5, %227, %232 : vector<8x128xi1>, vector<8x128xf32>
    %234 = vector.extract_strided_slice %233 {offsets = [0, 0], sizes = [8, 32], strides = [1, 1]} : vector<8x128xf32> to vector<8x32xf32>
    %235 = vector.extract_strided_slice %233 {offsets = [0, 32], sizes = [8, 32], strides = [1, 1]} : vector<8x128xf32> to vector<8x32xf32>
    %236 = vector.extract_strided_slice %233 {offsets = [0, 64], sizes = [8, 32], strides = [1, 1]} : vector<8x128xf32> to vector<8x32xf32>
    %237 = vector.extract_strided_slice %233 {offsets = [0, 96], sizes = [8, 32], strides = [1, 1]} : vector<8x128xf32> to vector<8x32xf32>
    %238 = arith.mulf %235, %200 : vector<8x32xf32>
    %239 = arith.mulf %234, %236 : vector<8x32xf32>
    %240 = arith.addf %238, %239 : vector<8x32xf32>
    %241 = math.tanh %240 : vector<8x32xf32>
    %242 = arith.mulf %237, %241 : vector<8x32xf32>
    %cst_51 = arith.constant dense<0.000000e+00> : vector<8x128xf32>
    %243 = tpu.matmul %242, %7, %cst_51 {dimension_numbers = #tpu.dot_dimension_numbers<[1], [0], [0], [1], [0, 0, 1, 1], [], []>} : vector<8x32xf32>, vector<32x128xf32>, vector<8x128xf32> -> vector<8x128xf32>
    %cst_52 = arith.constant dense<0.000000e+00> : vector<8x128xf32>
    %244 = tpu.matmul %223, %9, %cst_52 {dimension_numbers = #tpu.dot_dimension_numbers<[1], [0], [0], [1], [0, 0, 1, 1], [], []>} : vector<8x32xf32>, vector<32x128xf32>, vector<8x128xf32> -> vector<8x128xf32>
    %245 = arith.addf %243, %244 : vector<8x128xf32>
    %246 = vector.broadcast %11 : vector<1x128xf32> to vector<8x128xf32>
    %247 = arith.addf %245, %246 : vector<8x128xf32>
    %248 = math.tanh %247 : vector<8x128xf32>
    %249 = arith.negf %247 : vector<8x128xf32>
    %250 = math.exp %249 : vector<8x128xf32>
    %cst_53 = arith.constant 1.000000e+00 : f32
    %251 = vector.broadcast %cst_53 : f32 to vector<8x128xf32>
    %252 = arith.addf %251, %250 : vector<8x128xf32>
    %253 = arith.divf %251, %252 : vector<8x128xf32>
    %254 = arith.select %5, %248, %253 : vector<8x128xi1>, vector<8x128xf32>
    %255 = vector.extract_strided_slice %254 {offsets = [0, 0], sizes = [8, 32], strides = [1, 1]} : vector<8x128xf32> to vector<8x32xf32>
    %256 = vector.extract_strided_slice %254 {offsets = [0, 32], sizes = [8, 32], strides = [1, 1]} : vector<8x128xf32> to vector<8x32xf32>
    %257 = vector.extract_strided_slice %254 {offsets = [0, 64], sizes = [8, 32], strides = [1, 1]} : vector<8x128xf32> to vector<8x32xf32>
    %258 = vector.extract_strided_slice %254 {offsets = [0, 96], sizes = [8, 32], strides = [1, 1]} : vector<8x128xf32> to vector<8x32xf32>
    %259 = arith.mulf %256, %221 : vector<8x32xf32>
    %260 = arith.mulf %255, %257 : vector<8x32xf32>
    %261 = arith.addf %259, %260 : vector<8x32xf32>
    %262 = math.tanh %261 : vector<8x32xf32>
    %263 = arith.mulf %258, %262 : vector<8x32xf32>
    %c0_54 = arith.constant 0 : index
    %c0_55 = arith.constant 0 : index
    %264 = vector.load %arg9[%c0_54, %c0_55] : memref<32x4xf32, #tpu.memory_space<vmem>>, vector<32x4xf32>
    %cst_56 = arith.constant dense<0.000000e+00> : vector<8x4xf32>
    %265 = tpu.matmul %263, %264, %cst_56 {dimension_numbers = #tpu.dot_dimension_numbers<[1], [0], [0], [1], [0, 0, 1, 1], [], []>} : vector<8x32xf32>, vector<32x4xf32>, vector<8x4xf32> -> vector<8x4xf32>
    %c0_57 = arith.constant 0 : index
    %c0_58 = arith.constant 0 : index
    %266 = vector.load %arg10[%c0_57, %c0_58] : memref<1x4xf32, #tpu.memory_space<vmem>>, vector<1x4xf32>
    %267 = vector.broadcast %266 : vector<1x4xf32> to vector<8x4xf32>
    %268 = arith.addf %265, %267 : vector<8x4xf32>
    %c0_59 = arith.constant 0 : index
    %c0_60 = arith.constant 0 : index
    %269 = vector.load %arg11[%c0_59, %c0_60] : memref<8x4xf32, #tpu.memory_space<vmem>>, vector<8x4xf32>
    tpu.vector_store %arg11[%c0_59, %c0_60], %268 {strides = array<i32>} : memref<8x4xf32, #tpu.memory_space<vmem>>, vector<8x4xf32>,
    return
  }
}

</mosaic_0001>

<bundles_post_ra>
// kernel: lstm_model_forward.1
= control target key start
LH: loop header
LB: loop body
LE: loop exit
PB: predicated region body
PF: predicated region fallthrough
CT: control target
= control target key end

     0   :  { %16 = vsyncpa [#allocation3], 0  ;;  %s1867_s0 = inlined_call_operand.hbm [shape: f32[48,50], index: 0, kind: input, shape index: {}]   ;;  %s1868_s1 = inlined_call_operand.hbm [shape: f32[50,128], index: 1, kind: input, shape index: {}]   ;;  %s1869_s2 = inlined_call_operand.vmem [shape: f32[32,128], index: 2, kind: input, shape index: {}]   ;;  %s1870_s3 = inlined_call_operand.vmem [shape: f32[1,128], index: 3, kind: input, shape index: {}]   ;;  %s1871_s4 = inlined_call_operand.hbm [shape: f32[32,128], index: 4, kind: input, shape index: {}]   ;;  %s1872_s5 = inlined_call_operand.hbm [shape: f32[32,128], index: 5, kind: input, shape index: {}]   ;;  %s1873_s6 = inlined_call_operand.vmem [shape: f32[1,128], index: 6, kind: input, shape index: {}]   ;;  %s1874_s7 = inlined_call_operand.hbm [shape: f32[2,8,32], index: 7, kind: input, shape index: {}]   ;;  %s1875_s8 = inlined_call_operand.hbm [shape: f32[2,8,32], index: 8, kind: input, shape index: {}]   ;;  %s1876_s9 = inlined_call_operand.vmem [shape: f32[32,4], index: 9, kind: input, shape index: {}]   ;;  %s1877_s10 = inlined_call_operand.vmem [shape: f32[1,4], index: 10, kind: input, shape index: {}]   ;;  %s1878_s11 = inlined_call_operand.vmem [shape: f32[8,4], index: 11, kind: output, shape index: {}]  }
   0x1   :  { %17 = vsyncpa [#allocation5], 0 }
   0x2   :  { %18 = vsyncpa [#allocation8], 0 }
   0x3   :  { %19 = vsyncpa [#allocation11], 0  ;;  %s37_s19 = sshll.u32 %s1868_s1, 4  ;;  %s1474_s20 = smov [#allocation4]   ;;  %s38_s19 = int_to_ptr.hbm [resolvable:$true] %s37_s19 }
   0x4   :  { %s39_s21 = sshll.u32 %s1474_s20, 4  ;;  %s67_s24 = sshll.u32 %s1872_s5, 4  ;;  %s40_s21 = int_to_ptr.vmem [resolvable:$true] %s39_s21  ;;  %s68_s24 = int_to_ptr.hbm [resolvable:$true] %s67_s24 }
   0x5   :  { %s1475_s25 = smov 128   ;;  %s1476_s26 = smov 8  }
   0x6   :  { %45 = dma.hbm_to_vmem [thread:$0]  %s38_s19, 896, %s40_s21, [#allocation5], %s1475_s25, %s1475_s25, %s1476_s26  }
   0x7   :  { %s1477_s27 = smov [#allocation7]   ;;  %s24_s1 = sshll.u32 %s1867_s0, 4  ;;  %s25_s1 = int_to_ptr.hbm [resolvable:$true] %s24_s1 }
   0x8   :  { %s69_s28 = sshll.u32 %s1477_s27, 4  ;;  %s54_s13 = sshll.u32 %s1871_s4, 4  ;;  %s70_s28 = int_to_ptr.vmem [resolvable:$true] %s69_s28  ;;  %s55_s13 = int_to_ptr.hbm [resolvable:$true] %s54_s13 }
   0x9   :  { %75 = dma.hbm_to_vmem [thread:$0]  %s68_s24, 512, %s70_s28, [#allocation8], %s1475_s25, %s1475_s25, %s1476_s26  }
   0xa   :  { %s1478_s14 = smov [#allocation2]   ;;  %s1479_s16 = smov [#allocation6]  }
   0xb   :  { %s26_s15 = sshll.u32 %s1478_s14, 4  ;;  %s56_s0 = sshll.u32 %s1479_s16, 4  ;;  %s27_s15 = int_to_ptr.vmem [resolvable:$true] %s26_s15  ;;  %s57_s0 = int_to_ptr.vmem [resolvable:$true] %s56_s0 }
   0xc   :  { %32 = dma.hbm_to_vmem [thread:$0]  %s25_s1, 768, %s27_s15, [#allocation3], %s1475_s25, %s1475_s25, %s1476_s26  }
   0xd   :  { %s82_s19 = sshll.u32 %s1874_s7, 4  ;;  %s95_s21 = sshll.u32 %s1875_s8, 4  ;;  %s83_s19 = int_to_ptr.hbm [resolvable:$true] %s82_s19  ;;  %s96_s21 = int_to_ptr.hbm [resolvable:$true] %s95_s21 }
   0xe   :  { %62 = dma.hbm_to_vmem [thread:$0]  %s55_s13, 512, %s57_s0, [#allocation5], %s1475_s25, %s1475_s25, %s1476_s26  }
   0xf   :  { %s1480_s22 = smov [#allocation9]   ;;  %s1481_s24 = smov [#allocation10]  }
  0x10   :  { %s84_s23 = sshll.u32 %s1480_s22, 4  ;;  %s97_s7 = sshll.u32 %s1481_s24, 4  ;;  %s85_s23 = int_to_ptr.vmem [resolvable:$true] %s84_s23  ;;  %s98_s7 = int_to_ptr.vmem [resolvable:$true] %s97_s7 }
  0x11   :  { %90 = dma.hbm_to_vmem [thread:$0]  %s83_s19, 256, %s85_s23, [#allocation8], %s1475_s25, %s1475_s25, %s1476_s26  }
  0x12   :  { %103 = dma.hbm_to_vmem [thread:$0]  %s96_s21, 256, %s98_s7, [#allocation11], %s1475_s25, %s1475_s25, %s1476_s26  }
  0x13   :  { %1466 = dma.done.wait [#allocation3], 768  }
  0x14   :  { %1467 = vsyncadd [#allocation3], 4294966528 }
  0x15   :  { %1468 = dma.done.wait [#allocation5], 1408  }
  0x16   :  { %1469 = vsyncadd [#allocation5], 4294965888 }
  0x17   :  { %1470 = dma.done.wait [#allocation8], 768  }
  0x18   :  { %1471 = vsyncadd [#allocation8], 4294966528 }
  0x19   :  { %1472 = dma.done.wait [#allocation11], 256  }
  0x1a   :  { %1473 = vsyncadd [#allocation11], 4294967040  ;;  %vm192_vm0 = vcmask 1041408   ;;  %v143_v0 = vld [vmem:[#allocation4 + $0x30] sm:$0x3]  ;;  %v142_v1 = vld [vmem:[#allocation4 + $0x28] sm:$0xff]  ;;  %v132_v21 = vlaneseq }
  0x1b   :  { %1175 = vmatpush.msk.msra.mxu0 %vm192_vm0, %v143_v0  ;;  %v1583_v2 = vld [vmem:[%s1869_s2 + $0x18] sm:$0xff]  ;;  %v141_v3 = vld [vmem:[#allocation4 + $0x20] sm:$0xff]  ;;  %v1594_v5 = vld [vmem:[%s1869_s2 + $0x8] sm:$0xff]  ;;  %vm231_vm1 = vcmask 261120   ;;  %vm173_vm2 = vcmask 408576   ;;  %s1483_s12 = smov 32  }
  0x1c   :  { %247 = vmatpush.msra.mxu1 %v1583_v2  ;;  %v1589_v4 = vld [vmem:[%s1869_s2 + $0x10] sm:$0xff]  ;;  %v140_v6 = vld [vmem:[#allocation4 + $0x18] sm:$0xff]  ;;  %v1600_v7 = vld [vmem:[%s1869_s2] sm:$0xff]  ;;  %v133_v23 = vand.u32 127, %v132_v21 }
  0x1d   :  { %206 = vmatpush.msra.mxu0 %v142_v1  ;;  %v139_v8 = vld [vmem:[#allocation4 + $0x10] sm:$0xff]  ;;  %v158_v9 = vld [vmem:[#allocation9] sm:$0xff]  ;;  %v138_v10 = vld [vmem:[#allocation4 + $0x8] sm:$0xff] }
  0x1e   :  { %248 = vmatpush.msra.mxu1 %v1589_v4  ;;  %v137_v11 = vld [vmem:[#allocation4] sm:$0xff]  ;;  %v164_v12 = vld [vmem:[#allocation2] sm:$0xff]  ;;  %vm134_vm3 = vcmp.ge.s32.totalorder %v133_v23, 64  ;;  %vm135_vm4 = vcmp.lt.s32.totalorder %v133_v23, 96  ;;  %v161_v36 = vld [vmem:[#allocation10] sm:$0xff] }
  0x1f   :  { %207 = vmatpush.msra.mxu0 %v141_v3  ;;  %v1617_v13 = vld [vmem:[%s1870_s3] ss:$0 sm:$0xff]  ;;  %vm1620_vm6 = vmand %vm134_vm3, %vm135_vm4  ;;  %s1482_s3 = smov 64   ;;  %v1637_v46 = vld [vmem:[#allocation7 + $0x10] sm:$0xff] }
  0x20   :  { %249 = vmatpush.msra.mxu1 %v1594_v5  ;;  %v1633_v44 = vld [vmem:[#allocation7 + $0x18] sm:$0xff]  ;;  %v1641_v47 = vld [vmem:[#allocation6 + $0x10] sm:$0xff]  ;;  %v1643_v48 = vld [vmem:[#allocation7 + $0x8] sm:$0xff] }
  0x21   :  { %208 = vmatpush.msra.mxu0 %v140_v6  ;;  %v1635_v45 = vld [vmem:[#allocation6 + $0x18] sm:$0xff]  ;;  %313 = vmatpush.msra.mxu2 %v1633_v44  ;;  %v1645_v49 = vld [vmem:[#allocation6 + $0x8] sm:$0xff]  ;;  %v165_v50 = vld [vmem:[#allocation2 + $0x8] sm:$0xff] }
  0x22   :  { %250 = vmatpush.msra.mxu1 %v1600_v7  ;;  %338 = vmatpush.msra.mxu3 %v1635_v45  ;;  %v1650_v51 = vld [vmem:[#allocation7] sm:$0xff]  ;;  %v160_v55 = vld [vmem:[#allocation9 + $0x8] sm:$0xff]  ;;  %v163_v56 = vld [vmem:[#allocation10 + $0x8] sm:$0xff] }
  0x23   :  { %209 = vmatpush.msra.mxu0 %v139_v8  ;;  %1182 = vmatmul.msk.f32.vlgmr.msra.gmra.mxu1 %vm231_vm1, %v158_v9  ;;  %v1652_v52 = vld [vmem:[#allocation6] sm:$0xff]  ;;  %v1687_v0 = vld [vmem:[%s1873_s6] ss:$0 sm:$0xff]  ;;  %v1134_v29 = vld [vmem:[%s1876_s9 + $0x10] sm:$0xff] }
  0x24   :  { %404 = vmatpush.msrb.mxu1 %v1583_v2  ;;  %314 = vmatpush.msra.mxu2 %v1637_v46 }
  0x25   :  { %210 = vmatpush.msra.mxu0 %v138_v10  ;;  %339 = vmatpush.msra.mxu3 %v1641_v47 }
  0x26   :  { %405 = vmatpush.msrb.mxu1 %v1589_v4  ;;  %315 = vmatpush.msra.mxu2 %v1643_v48 }
  0x27   :  { %211 = vmatpush.msra.mxu0 %v137_v11  ;;  %340 = vmatpush.msra.mxu3 %v1645_v49 }
  0x28   :  { %1176 = vmatmul.msk.f32.vlgmr.msra.gmra.mxu0 %vm173_vm2, %v164_v12  ;;  %406 = vmatpush.msrb.mxu1 %v1594_v5 }
  0x29   :  { %316 = vmatpush.msra.mxu2 %v1650_v51  ;;  %341 = vmatpush.msra.mxu3 %v1652_v52 }
  0x2a   :  { %407 = vmatpush.msrb.mxu1 %v1600_v7  ;;  %1184 = vmatmul.msk.f32.vlgmr.msra.gmra.mxu2 %vm231_vm1, %v160_v55 }
  0x2b   :  { %468 = vmatpush.msrb.mxu2 %v1633_v44  ;;  %493 = vmatpush.msrb.mxu3 %v1635_v45 }
  0x2c   :  { %552 = vmatpush.msra.mxu1 %v1583_v2 }
  0x2d   :  { %469 = vmatpush.msrb.mxu2 %v1637_v46  ;;  %494 = vmatpush.msrb.mxu3 %v1641_v47 }
  0x2e   :  { %553 = vmatpush.msra.mxu1 %v1589_v4 }
  0x2f   :  { %470 = vmatpush.msrb.mxu2 %v1643_v48  ;;  %495 = vmatpush.msrb.mxu3 %v1645_v49 }
  0x30   :  { %554 = vmatpush.msra.mxu1 %v1594_v5  ;;  %1177 = vmatmul.msk.f32.gmra.mxu0 %vm173_vm2, %v165_v50 }
  0x31   :  { %471 = vmatpush.msrb.mxu2 %v1650_v51  ;;  %496 = vmatpush.msrb.mxu3 %v1652_v52 }
  0x32   :  { %555 = vmatpush.msra.mxu1 %v1600_v7 }
  0x33   :  { %616 = vmatpush.msra.mxu2 %v1633_v44 }
  0x35   :  { %617 = vmatpush.msra.mxu2 %v1637_v46 }
  0x37   :  { %618 = vmatpush.msra.mxu2 %v1643_v48 }
  0x39   :  { %619 = vmatpush.msra.mxu2 %v1650_v51 }
  0xa0   :  { %v252_v15 = vpop.f32.mrf.mxu1 }
  0xa5   :  { %v213_v14 = vpop.f32.mrf.mxu0 }
  0xa6   :  { %v214_v16 = vadd.f32 %v1617_v13, %v213_v14 }
  0xa8   :  { %v255_v17 = vadd.f32 %v252_v15, %v214_v16 }
  0xaa   :  { %v1183_v18 = vmul.f32 -1.442695, %v255_v17 }
  0xac   :  { %1226 = vpow2.f32 %v1183_v18 }
  0xad   :  { %v216_v58 = vpop.f32.mrf.mxu0  ;;  %v318_v63 = vpop.f32.mrf.mxu2 }
  0xae   :  { %v217_v59 = vadd.f32 %v1617_v13, %v216_v58 }
  0xb2   :  { %v1227_v19 = vpop.eup %1226 }
  0xb3   :  { %v260_v20 = vadd.f32 1.0, %v1227_v19 }
  0xb5   :  { %1228 = vrcp.f32 %v260_v20  ;;  %v272_v26 = vand.u32 2147483648, %v260_v20  ;;  %v270_v28 = vand.u32 2147483647, %v260_v20  ;;  %vm266_vm7 = vweird.f32 %v260_v20 }
  0xb6   :  { %1230 = vtanh.f32 %v255_v17 }
  0xb7   :  { %v273_v31 = vor.u32 1.1754944e-38, %v272_v26  ;;  %vm271_vm9 = vcmp.eq.f32.partialorder %v270_v28, 8.507059e+37 }
  0xbb   :  { %v1229_v22 = vpop.eup %1228 }
  0xbc   :  { %v262_v24 = vmul.f32 %v1229_v22, %v260_v20  ;;  %vm267_vm5 = vweird.f32 %v1229_v22  ;;  %v1231_v33 = vpop.eup %1230 }
  0xbd   :  { %vm268_vm8 = vmor %vm266_vm7, %vm267_vm5 }
  0xbe   :  { %v263_v25 = vsub.f32 1.0, %v262_v24 }
  0xc0   :  { %v264_v27 = vmul.f32 %v1229_v22, %v263_v25 }
  0xc2   :  { %v265_v30 = vadd.f32 %v1229_v22, %v264_v27 }
  0xc4   :  { %v269_v32 = vsel %vm268_vm8, %v1229_v22, %v265_v30 }
  0xc5   :  { %v274_v34 = vsel %vm271_vm9, %v273_v31, %v269_v32 }
  0xc6   :  { %v276_v35 = vsel %vm1620_vm6, %v1231_v33, %v274_v34 }
  0xc7   :  { %283 = vrot.lane.b32.xlu0 %v276_v35, %s1482_s3 }
  0xcf   :  { %278 = vrot.lane.b32.xlu0 %v161_v36, %s1483_s12 }
 0x139   :  { %v284_v37 = vpop.permute.xlu0 %283 }
 0x13a   :  { %v286_v38 = vmul.f32 %v284_v37, %v276_v35 }
 0x13c   :  { %288 = vrot.lane.b32.xlu1 %v286_v38, %s1483_s12 }
 0x141   :  { %v279_v39 = vpop.permute.xlu0 %278 }
 0x142   :  { %v281_v40 = vmul.f32 %v279_v39, %v276_v35 }
 0x1ae   :  { %v289_v41 = vpop.permute.xlu1 %288 }
 0x1af   :  { %v1629_v42 = vadd.f32 %v289_v41, %v281_v40 }
 0x1b1   :  { %1232 = vtanh.f32 %v1629_v42 }
 0x1b7   :  { %v1233_v43 = vpop.eup %1232 }
 0x1b8   :  { %294 = vrot.lane.b32.xlu1 %v1233_v43, %s1482_s3 }
 0x1c0   :  { %372 = vrot.lane.b32.xlu1 %v163_v56, %s1483_s12 }
 0x22a   :  { %v295_v53 = vpop.permute.xlu1 %294 }
 0x22b   :  { %v297_v54 = vmul.f32 %v295_v53, %v276_v35 }
 0x22d   :  { %322 = vrot.lane.b32.xlu2 %v297_v54, %s1483_s12 }
 0x232   :  { %v373_v50 = vpop.permute.xlu1 %372 }
 0x287   :  { %v323_v57 = vpop.permute.xlu2 %322 }
 0x288   :  { %1185 = vmatmul.msk.f32.vlgmr.msra.gmra.mxu3 %vm231_vm1, %v323_v57  ;;  %1187 = vmatmul.msk.f32.vlgmr.msrb.gmra.mxu1 %vm231_vm1, %v323_v57 }
 0x289   :  { %641 = vmatpush.msra.mxu3 %v1635_v45  ;;  %700 = vmatpush.msrb.mxu1 %v1583_v2 }
 0x28b   :  { %642 = vmatpush.msra.mxu3 %v1641_v47  ;;  %701 = vmatpush.msrb.mxu1 %v1589_v4 }
 0x28d   :  { %643 = vmatpush.msra.mxu3 %v1645_v49  ;;  %702 = vmatpush.msrb.mxu1 %v1594_v5 }
 0x28f   :  { %644 = vmatpush.msra.mxu3 %v1652_v52  ;;  %703 = vmatpush.msrb.mxu1 %v1600_v7 }
 0x305   :  { %v409_v60 = vpop.f32.mrf.mxu1 }
 0x306   :  { %v412_v61 = vadd.f32 %v409_v60, %v217_v59 }
 0x308   :  { %v1188_v62 = vmul.f32 -1.442695, %v412_v61 }
 0x30a   :  { %1234 = vpow2.f32 %v1188_v62 }
 0x30b   :  { %v343_v1 = vpop.f32.mrf.mxu3 }
 0x30c   :  { %v344_v3 = vadd.f32 %v343_v1, %v318_v63 }
 0x30e   :  { %v349_v6 = vadd.f32 %v1687_v0, %v344_v3  ;;  %v166_v3 = vld [vmem:[#allocation2 + $0x10] sm:$0xff] }
 0x30f   :  { %1178 = vmatmul.msk.f32.gmra.mxu0 %vm173_vm2, %v166_v3 }
 0x310   :  { %v1235_v8 = vpop.eup %1234  ;;  %v1186_v9 = vmul.f32 -1.442695, %v349_v6 }
 0x311   :  { %v417_v10 = vadd.f32 1.0, %v1235_v8 }
 0x312   :  { %1236 = vpow2.f32 %v1186_v9 }
 0x313   :  { %1238 = vrcp.f32 %v417_v10  ;;  %v429_v17 = vand.u32 2147483648, %v417_v10  ;;  %v427_v19 = vand.u32 2147483647, %v417_v10  ;;  %vm423_vm11 = vweird.f32 %v417_v10 }
 0x315   :  { %v430_v22 = vor.u32 1.1754944e-38, %v429_v17  ;;  %vm428_vm13 = vcmp.eq.f32.partialorder %v427_v19, 8.507059e+37 }
 0x318   :  { %v1237_v11 = vpop.eup %1236 }
 0x319   :  { %v1239_v12 = vpop.eup %1238  ;;  %v354_v14 = vadd.f32 1.0, %v1237_v11 }
 0x31a   :  { %v419_v15 = vmul.f32 %v1239_v12, %v417_v10  ;;  %vm424_vm10 = vweird.f32 %v1239_v12 }
 0x31b   :  { %1240 = vrcp.f32 %v354_v14  ;;  %vm425_vm12 = vmor %vm423_vm11, %vm424_vm10  ;;  %v366_v30 = vand.u32 2147483648, %v354_v14  ;;  %v364_v32 = vand.u32 2147483647, %v354_v14  ;;  %vm360_vm15 = vweird.f32 %v354_v14 }
 0x31c   :  { %v420_v16 = vsub.f32 1.0, %v419_v15  ;;  %1242 = vtanh.f32 %v412_v61 }
 0x31d   :  { %1244 = vtanh.f32 %v349_v6  ;;  %v367_v34 = vor.u32 1.1754944e-38, %v366_v30  ;;  %vm365_vm3 = vcmp.eq.f32.partialorder %v364_v32, 8.507059e+37 }
 0x31e   :  { %v421_v18 = vmul.f32 %v1239_v12, %v420_v16 }
 0x320   :  { %v422_v20 = vadd.f32 %v1239_v12, %v421_v18 }
 0x321   :  { %v1241_v21 = vpop.eup %1240 }
 0x322   :  { %v426_v23 = vsel %vm425_vm12, %v1239_v12, %v422_v20  ;;  %v356_v24 = vmul.f32 %v1241_v21, %v354_v14  ;;  %v1243_v25 = vpop.eup %1242  ;;  %vm361_vm14 = vweird.f32 %v1241_v21 }
 0x323   :  { %v431_v26 = vsel %vm428_vm13, %v430_v22, %v426_v23  ;;  %vm362_vm0 = vmor %vm360_vm15, %vm361_vm14  ;;  %v1245_v36 = vpop.eup %1244 }
 0x324   :  { %v433_v27 = vsel %vm1620_vm6, %v1243_v25, %v431_v26  ;;  %v357_v28 = vsub.f32 1.0, %v356_v24 }
 0x325   :  { %436 = vrot.lane.b32.xlu0 %v433_v27, %s1482_s3  ;;  %v434_v57 = vmul.f32 %v433_v27, %v1629_v42 }
 0x326   :  { %v358_v31 = vmul.f32 %v1241_v21, %v357_v28 }
 0x328   :  { %v359_v33 = vadd.f32 %v1241_v21, %v358_v31 }
 0x32a   :  { %v363_v35 = vsel %vm362_vm0, %v1241_v21, %v359_v33 }
 0x32b   :  { %v368_v37 = vsel %vm365_vm3, %v367_v34, %v363_v35 }
 0x32c   :  { %v370_v38 = vsel %vm1620_vm6, %v1245_v36, %v368_v37 }
 0x32d   :  { %377 = vrot.lane.b32.xlu2 %v370_v38, %s1482_s3  ;;  %v375_v53 = vmul.f32 %v373_v50, %v370_v38 }
 0x387   :  { %v378_v39 = vpop.permute.xlu2 %377 }
 0x388   :  { %v380_v40 = vmul.f32 %v378_v39, %v370_v38 }
 0x38a   :  { %382 = vrot.lane.b32.xlu2 %v380_v40, %s1483_s12 }
 0x38c   :  { %v219_v8 = vpop.f32.mrf.mxu0 }
 0x38d   :  { %v220_v9 = vadd.f32 %v1617_v13, %v219_v8 }
 0x397   :  { %v437_v41 = vpop.permute.xlu0 %436 }
 0x398   :  { %v439_v43 = vmul.f32 %v437_v41, %v433_v27 }
 0x39a   :  { %441 = vrot.lane.b32.xlu0 %v439_v43, %s1483_s12 }
 0x3e4   :  { %v383_v54 = vpop.permute.xlu2 %382 }
 0x3e5   :  { %v1698_v55 = vadd.f32 %v383_v54, %v375_v53 }
 0x3e7   :  { %1246 = vtanh.f32 %v1698_v55 }
 0x3ed   :  { %v1247_v56 = vpop.eup %1246 }
 0x3ee   :  { %388 = vrot.lane.b32.xlu1 %v1247_v56, %s1482_s3 }
 0x40c   :  { %v442_v58 = vpop.permute.xlu0 %441 }
 0x40d   :  { %v1703_v59 = vadd.f32 %v442_v58, %v434_v57 }
 0x40f   :  { %1248 = vtanh.f32 %v1703_v59 }
 0x415   :  { %v1249_v60 = vpop.eup %1248 }
 0x416   :  { %447 = vrot.lane.b32.xlu2 %v1249_v60, %s1482_s3 }
 0x460   :  { %v389_v61 = vpop.permute.xlu1 %388 }
 0x461   :  { %v391_v62 = vmul.f32 %v389_v61, %v370_v38 }
 0x463   :  { %452 = vrot.lane.b32.xlu0 %v391_v62, %s1483_s12 }
 0x470   :  { %v448_v63 = vpop.permute.xlu2 %447 }
 0x471   :  { %v450_v1 = vmul.f32 %v448_v63, %v433_v27 }
 0x473   :  { %477 = vrot.lane.b32.xlu1 %v450_v1, %s1483_s12 }
 0x4d5   :  { %v453_v42 = vpop.permute.xlu0 %452 }
 0x4d6   :  { %1189 = vmatmul.msk.f32.vlgmr.msrb.gmra.mxu2 %vm231_vm1, %v453_v42 }
 0x4d7   :  { %764 = vmatpush.msrb.mxu2 %v1633_v44 }
 0x4d9   :  { %765 = vmatpush.msrb.mxu2 %v1637_v46 }
 0x4db   :  { %766 = vmatpush.msrb.mxu2 %v1643_v48 }
 0x4dd   :  { %767 = vmatpush.msrb.mxu2 %v1650_v51 }
 0x4e5   :  { %v478_v6 = vpop.permute.xlu1 %477 }
 0x4e6   :  { %1190 = vmatmul.msk.f32.vlgmr.msrb.gmra.mxu3 %vm231_vm1, %v478_v6  ;;  %1192 = vmatmul.msk.f32.vlgmr.msra.gmra.mxu1 %vm231_vm1, %v478_v6 }
 0x4e7   :  { %789 = vmatpush.msrb.mxu3 %v1635_v45  ;;  %848 = vmatpush.msra.mxu1 %v1583_v2 }
 0x4e9   :  { %790 = vmatpush.msrb.mxu3 %v1641_v47  ;;  %849 = vmatpush.msra.mxu1 %v1589_v4 }
 0x4eb   :  { %791 = vmatpush.msrb.mxu3 %v1645_v49  ;;  %850 = vmatpush.msra.mxu1 %v1594_v5 }
 0x4ed   :  { %792 = vmatpush.msrb.mxu3 %v1652_v52  ;;  %851 = vmatpush.msra.mxu1 %v1600_v7 }
 0x559   :  { %v473_v14 = vpop.f32.mrf.mxu2 }
 0x563   :  { %v557_v10 = vpop.f32.mrf.mxu1 }
 0x564   :  { %v560_v11 = vadd.f32 %v557_v10, %v220_v9 }
 0x566   :  { %v1193_v12 = vmul.f32 -1.442695, %v560_v11 }
 0x568   :  { %1250 = vpow2.f32 %v1193_v12 }
 0x569   :  { %v498_v15 = vpop.f32.mrf.mxu3 }
 0x56a   :  { %v499_v16 = vadd.f32 %v498_v15, %v473_v14 }
 0x56c   :  { %v501_v17 = vadd.f32 %v1687_v0, %v499_v16 }
 0x56e   :  { %v1251_v18 = vpop.eup %1250  ;;  %v1191_v19 = vmul.f32 -1.442695, %v501_v17 }
 0x56f   :  { %v565_v20 = vadd.f32 1.0, %v1251_v18 }
 0x570   :  { %1252 = vpow2.f32 %v1191_v19 }
 0x571   :  { %1254 = vrcp.f32 %v565_v20  ;;  %v577_v26 = vand.u32 2147483648, %v565_v20  ;;  %v575_v28 = vand.u32 2147483647, %v565_v20  ;;  %vm571_vm5 = vweird.f32 %v565_v20 }
 0x573   :  { %v578_v32 = vor.u32 1.1754944e-38, %v577_v26  ;;  %vm576_vm8 = vcmp.eq.f32.partialorder %v575_v28, 8.507059e+37 }
 0x576   :  { %v1253_v21 = vpop.eup %1252 }
 0x577   :  { %v1255_v22 = vpop.eup %1254  ;;  %v506_v23 = vadd.f32 1.0, %v1253_v21 }
 0x578   :  { %v567_v24 = vmul.f32 %v1255_v22, %v565_v20  ;;  %vm572_vm4 = vweird.f32 %v1255_v22 }
 0x579   :  { %1256 = vrcp.f32 %v506_v23  ;;  %vm573_vm7 = vmor %vm571_vm5, %vm572_vm4  ;;  %v518_v39 = vand.u32 2147483648, %v506_v23  ;;  %v516_v41 = vand.u32 2147483647, %v506_v23  ;;  %vm512_vm10 = vweird.f32 %v506_v23 }
 0x57a   :  { %v568_v25 = vsub.f32 1.0, %v567_v24  ;;  %1258 = vtanh.f32 %v560_v11 }
 0x57b   :  { %1260 = vtanh.f32 %v501_v17  ;;  %v519_v50 = vor.u32 1.1754944e-38, %v518_v39  ;;  %vm517_vm12 = vcmp.eq.f32.partialorder %v516_v41, 8.507059e+37 }
 0x57c   :  { %v569_v27 = vmul.f32 %v1255_v22, %v568_v25 }
 0x57e   :  { %v570_v30 = vadd.f32 %v1255_v22, %v569_v27 }
 0x57f   :  { %v1257_v31 = vpop.eup %1256 }
 0x580   :  { %v574_v33 = vsel %vm573_vm7, %v1255_v22, %v570_v30  ;;  %v508_v34 = vmul.f32 %v1257_v31, %v506_v23  ;;  %v1259_v35 = vpop.eup %1258  ;;  %vm513_vm9 = vweird.f32 %v1257_v31 }
 0x581   :  { %v579_v36 = vsel %vm576_vm8, %v578_v32, %v574_v33  ;;  %vm514_vm11 = vmor %vm512_vm10, %vm513_vm9  ;;  %v1261_v54 = vpop.eup %1260 }
 0x582   :  { %v581_v37 = vsel %vm1620_vm6, %v1259_v35, %v579_v36  ;;  %v509_v38 = vsub.f32 1.0, %v508_v34 }
 0x583   :  { %584 = vrot.lane.b32.xlu0 %v581_v37, %s1482_s3  ;;  %v582_v63 = vmul.f32 %v581_v37, %v1703_v59 }
 0x584   :  { %v510_v40 = vmul.f32 %v1257_v31, %v509_v38 }
 0x586   :  { %v511_v43 = vadd.f32 %v1257_v31, %v510_v40 }
 0x588   :  { %v515_v53 = vsel %vm514_vm11, %v1257_v31, %v511_v43 }
 0x589   :  { %v520_v56 = vsel %vm517_vm12, %v519_v50, %v515_v53 }
 0x58a   :  { %v522_v57 = vsel %vm1620_vm6, %v1261_v54, %v520_v56 }
 0x58b   :  { %525 = vrot.lane.b32.xlu2 %v522_v57, %s1482_s3  ;;  %v523_v42 = vmul.f32 %v522_v57, %v1698_v55  ;;  %v167_v55 = vld [vmem:[#allocation2 + $0x18] sm:$0xff] }
 0x58c   :  { %1179 = vmatmul.msk.f32.gmra.mxu0 %vm173_vm2, %v167_v55 }
 0x5e5   :  { %v526_v58 = vpop.permute.xlu2 %525 }
 0x5e6   :  { %v528_v60 = vmul.f32 %v526_v58, %v522_v57 }
 0x5e8   :  { %530 = vrot.lane.b32.xlu1 %v528_v60, %s1483_s12 }
 0x5f5   :  { %v585_v61 = vpop.permute.xlu0 %584 }
 0x5f6   :  { %v587_v62 = vmul.f32 %v585_v61, %v581_v37 }
 0x5f8   :  { %589 = vrot.lane.b32.xlu2 %v587_v62, %s1483_s12 }
 0x609   :  { %v222_v17 = vpop.f32.mrf.mxu0 }
 0x60a   :  { %v223_v18 = vadd.f32 %v1617_v13, %v222_v17 }
 0x652   :  { %v590_v1 = vpop.permute.xlu2 %589 }
 0x653   :  { %v1736_v3 = vadd.f32 %v590_v1, %v582_v63 }
 0x655   :  { %1262 = vtanh.f32 %v1736_v3 }
 0x65a   :  { %v531_v6 = vpop.permute.xlu1 %530 }
 0x65b   :  { %v1263_v8 = vpop.eup %1262  ;;  %v1740_v9 = vadd.f32 %v531_v6, %v523_v42 }
 0x65c   :  { %595 = vrot.lane.b32.xlu1 %v1263_v8, %s1482_s3 }
 0x65d   :  { %1264 = vtanh.f32 %v1740_v9 }
 0x663   :  { %v1265_v10 = vpop.eup %1264 }
 0x664   :  { %536 = vrot.lane.b32.xlu0 %v1265_v10, %s1482_s3 }
 0x6ce   :  { %v596_v11 = vpop.permute.xlu1 %595 }
 0x6cf   :  { %v598_v59 = vmul.f32 %v596_v11, %v581_v37 }
 0x6d1   :  { %625 = vrot.lane.b32.xlu0 %v598_v59, %s1483_s12 }
 0x6d6   :  { %v537_v12 = vpop.permute.xlu0 %536 }
 0x6d7   :  { %v539_v14 = vmul.f32 %v537_v12, %v522_v57 }
 0x6d9   :  { %600 = vrot.lane.b32.xlu2 %v539_v14, %s1483_s12 }
 0x733   :  { %v601_v15 = vpop.permute.xlu2 %600 }
 0x734   :  { %1194 = vmatmul.msk.f32.vlgmr.msra.gmra.mxu2 %vm231_vm1, %v601_v15 }
 0x735   :  { %912 = vmatpush.msra.mxu2 %v1633_v44 }
 0x737   :  { %913 = vmatpush.msra.mxu2 %v1637_v46 }
 0x739   :  { %914 = vmatpush.msra.mxu2 %v1643_v48 }
 0x73b   :  { %915 = vmatpush.msra.mxu2 %v1650_v51 }
 0x743   :  { %v626_v16 = vpop.permute.xlu0 %625 }
 0x744   :  { %1195 = vmatmul.msk.f32.vlgmr.msra.gmra.mxu3 %vm231_vm1, %v626_v16  ;;  %1197 = vmatmul.msk.f32.vlgmr.msrb.gmra.mxu1 %vm231_vm1, %v626_v16  ;;  %v168_v16 = vld [vmem:[#allocation2 + $0x20] sm:$0xff] }
 0x745   :  { %937 = vmatpush.msra.mxu3 %v1635_v45  ;;  %996 = vmatpush.msrb.mxu1 %v1583_v2 }
 0x746   :  { %1180 = vmatmul.msk.f32.gmra.mxu0 %vm173_vm2, %v168_v16 }
 0x747   :  { %938 = vmatpush.msra.mxu3 %v1641_v47  ;;  %997 = vmatpush.msrb.mxu1 %v1589_v4 }
 0x749   :  { %939 = vmatpush.msra.mxu3 %v1645_v49  ;;  %998 = vmatpush.msrb.mxu1 %v1594_v5 }
 0x74b   :  { %940 = vmatpush.msra.mxu3 %v1652_v52  ;;  %999 = vmatpush.msrb.mxu1 %v1600_v7 }
 0x7b7   :  { %v621_v2 = vpop.f32.mrf.mxu2 }
 0x7c1   :  { %v705_v19 = vpop.f32.mrf.mxu1 }
 0x7c2   :  { %v708_v20 = vadd.f32 %v705_v19, %v223_v18 }
 0x7c4   :  { %v1198_v21 = vmul.f32 -1.442695, %v708_v20 }
 0x7c6   :  { %1266 = vpow2.f32 %v1198_v21  ;;  %v225_v21 = vpop.f32.mrf.mxu0 }
 0x7c7   :  { %v646_v22 = vpop.f32.mrf.mxu3 }
 0x7c8   :  { %v647_v23 = vadd.f32 %v646_v22, %v621_v2 }
 0x7ca   :  { %v649_v4 = vadd.f32 %v1687_v0, %v647_v23 }
 0x7cc   :  { %v1267_v24 = vpop.eup %1266  ;;  %v1196_v25 = vmul.f32 -1.442695, %v649_v4 }
 0x7cd   :  { %v713_v26 = vadd.f32 1.0, %v1267_v24 }
 0x7ce   :  { %1268 = vpow2.f32 %v1196_v25 }
 0x7cf   :  { %1270 = vrcp.f32 %v713_v26  ;;  %v725_v31 = vand.u32 2147483648, %v713_v26  ;;  %v723_v33 = vand.u32 2147483647, %v713_v26  ;;  %vm719_vm14 = vweird.f32 %v713_v26 }
 0x7d1   :  { %v726_v36 = vor.u32 1.1754944e-38, %v725_v31  ;;  %vm724_vm0 = vcmp.eq.f32.partialorder %v723_v33, 8.507059e+37 }
 0x7d4   :  { %v1269_v5 = vpop.eup %1268 }
 0x7d5   :  { %v1271_v27 = vpop.eup %1270  ;;  %v654_v7 = vadd.f32 1.0, %v1269_v5 }
 0x7d6   :  { %v715_v28 = vmul.f32 %v1271_v27, %v713_v26  ;;  %vm720_vm13 = vweird.f32 %v1271_v27 }
 0x7d7   :  { %1272 = vrcp.f32 %v654_v7  ;;  %vm721_vm15 = vmor %vm719_vm14, %vm720_vm13  ;;  %v666_v50 = vand.u32 2147483648, %v654_v7  ;;  %v664_v54 = vand.u32 2147483647, %v654_v7  ;;  %vm660_vm4 = vweird.f32 %v654_v7 }
 0x7d8   :  { %v716_v30 = vsub.f32 1.0, %v715_v28  ;;  %1274 = vtanh.f32 %v708_v20 }
 0x7d9   :  { %1276 = vtanh.f32 %v649_v4  ;;  %v667_v57 = vor.u32 1.1754944e-38, %v666_v50  ;;  %vm665_vm7 = vcmp.eq.f32.partialorder %v664_v54, 8.507059e+37 }
 0x7da   :  { %v717_v32 = vmul.f32 %v1271_v27, %v716_v30 }
 0x7dc   :  { %v718_v34 = vadd.f32 %v1271_v27, %v717_v32 }
 0x7dd   :  { %v1273_v35 = vpop.eup %1272 }
 0x7de   :  { %v722_v37 = vsel %vm721_vm15, %v1271_v27, %v718_v34  ;;  %v656_v38 = vmul.f32 %v1273_v35, %v654_v7  ;;  %v1275_v39 = vpop.eup %1274  ;;  %vm661_vm3 = vweird.f32 %v1273_v35 }
 0x7df   :  { %v727_v40 = vsel %vm724_vm0, %v726_v36, %v722_v37  ;;  %vm662_vm5 = vmor %vm660_vm4, %vm661_vm3  ;;  %v1277_v60 = vpop.eup %1276 }
 0x7e0   :  { %v729_v41 = vsel %vm1620_vm6, %v1275_v39, %v727_v40  ;;  %v657_v43 = vsub.f32 1.0, %v656_v38 }
 0x7e1   :  { %732 = vrot.lane.b32.xlu2 %v729_v41, %s1482_s3  ;;  %v730_v8 = vmul.f32 %v729_v41, %v1736_v3 }
 0x7e2   :  { %v658_v53 = vmul.f32 %v1273_v35, %v657_v43 }
 0x7e4   :  { %v659_v56 = vadd.f32 %v1273_v35, %v658_v53 }
 0x7e6   :  { %v663_v58 = vsel %vm662_vm5, %v1273_v35, %v659_v56 }
 0x7e7   :  { %v668_v61 = vsel %vm665_vm7, %v667_v57, %v663_v58 }
 0x7e8   :  { %v670_v62 = vsel %vm1620_vm6, %v1277_v60, %v668_v61 }
 0x7e9   :  { %673 = vrot.lane.b32.xlu1 %v670_v62, %s1482_s3  ;;  %v671_v12 = vmul.f32 %v670_v62, %v1740_v9 }
 0x83b   :  { %v733_v63 = vpop.permute.xlu2 %732 }
 0x83c   :  { %v735_v1 = vmul.f32 %v733_v63, %v729_v41 }
 0x83e   :  { %737 = vrot.lane.b32.xlu1 %v735_v1, %s1483_s12 }
 0x85b   :  { %v674_v42 = vpop.permute.xlu1 %673 }
 0x85c   :  { %v676_v6 = vmul.f32 %v674_v42, %v670_v62 }
 0x85e   :  { %678 = vrot.lane.b32.xlu0 %v676_v6, %s1483_s12 }
 0x8b0   :  { %v738_v10 = vpop.permute.xlu1 %737 }
 0x8b1   :  { %v1774_v11 = vadd.f32 %v738_v10, %v730_v8 }
 0x8b3   :  { %1278 = vtanh.f32 %v1774_v11 }
 0x8b9   :  { %v1279_v59 = vpop.eup %1278 }
 0x8ba   :  { %743 = vrot.lane.b32.xlu0 %v1279_v59, %s1482_s3 }
 0x8d0   :  { %v679_v14 = vpop.permute.xlu0 %678 }
 0x8d1   :  { %v1779_v55 = vadd.f32 %v679_v14, %v671_v12 }
 0x8d3   :  { %1280 = vtanh.f32 %v1779_v55 }
 0x8d9   :  { %v1281_v15 = vpop.eup %1280 }
 0x8da   :  { %684 = vrot.lane.b32.xlu2 %v1281_v15, %s1482_s3  ;;  %v169_v15 = vld [vmem:[#allocation2 + $0x28] sm:$0xff] }
 0x8db   :  { %1181 = vmatmul.msk.f32.gmra.mxu0 %vm173_vm2, %v169_v15 }
 0x92c   :  { %v744_v3 = vpop.permute.xlu0 %743 }
 0x92d   :  { %v746_v17 = vmul.f32 %v744_v3, %v729_v41 }
 0x92f   :  { %773 = vrot.lane.b32.xlu2 %v746_v17, %s1483_s12 }
 0x934   :  { %v685_v18 = vpop.permute.xlu2 %684 }
 0x935   :  { %v687_v19 = vmul.f32 %v685_v18, %v670_v62 }
 0x937   :  { %748 = vrot.lane.b32.xlu1 %v687_v19, %s1483_s12 }
 0x958   :  { %v228_v18 = vpop.f32.mrf.mxu0 }
 0x959   :  { %v229_v19 = vadd.f32 %v1617_v13, %v228_v18 }
 0x989   :  { %v774_v9 = vpop.permute.xlu2 %773 }
 0x98a   :  { %1200 = vmatmul.msk.f32.vlgmr.msrb.gmra.mxu3 %vm231_vm1, %v774_v9  ;;  %1202 = vmatmul.msk.f32.vlgmr.msra.gmra.mxu1 %vm231_vm1, %v774_v9 }
 0x98b   :  { %1085 = vmatpush.msrb.mxu3 %v1635_v45  ;;  %v226_v45 = vadd.f32 %v1617_v13, %v225_v21 }
 0x98d   :  { %1086 = vmatpush.msrb.mxu3 %v1641_v47 }
 0x98f   :  { %1087 = vmatpush.msrb.mxu3 %v1645_v49 }
 0x991   :  { %1088 = vmatpush.msrb.mxu3 %v1652_v52 }
 0x9a9   :  { %v749_v20 = vpop.permute.xlu1 %748 }
 0x9aa   :  { %1199 = vmatmul.msk.f32.vlgmr.msrb.gmra.mxu2 %vm231_vm1, %v749_v20 }
 0x9ab   :  { %1060 = vmatpush.msrb.mxu2 %v1633_v44 }
 0x9ad   :  { %1061 = vmatpush.msrb.mxu2 %v1637_v46 }
 0x9af   :  { %1062 = vmatpush.msrb.mxu2 %v1643_v48 }
 0x9b1   :  { %1063 = vmatpush.msrb.mxu2 %v1650_v51 }
 0xa07   :  { %v853_v2 = vpop.f32.mrf.mxu1 }
 0xa08   :  { %v856_v47 = vadd.f32 %v853_v2, %v226_v45 }
 0xa0a   :  { %v1203_v22 = vmul.f32 -1.442695, %v856_v47 }
 0xa0c   :  { %1282 = vpow2.f32 %v1203_v22 }
 0xa0d   :  { %v794_v28 = vpop.f32.mrf.mxu3 }
 0xa12   :  { %v1283_v49 = vpop.eup %1282 }
 0xa13   :  { %v861_v52 = vadd.f32 1.0, %v1283_v49 }
 0xa15   :  { %1284 = vrcp.f32 %v861_v52  ;;  %v873_v44 = vand.u32 2147483648, %v861_v52  ;;  %v871_v48 = vand.u32 2147483647, %v861_v52  ;;  %vm867_vm9 = vweird.f32 %v861_v52 }
 0xa16   :  { %1286 = vtanh.f32 %v856_v47 }
 0xa17   :  { %v874_v51 = vor.u32 1.1754944e-38, %v873_v44  ;;  %vm872_vm11 = vcmp.eq.f32.partialorder %v871_v48, 8.507059e+37 }
 0xa1b   :  { %v1285_v23 = vpop.eup %1284 }
 0xa1c   :  { %v863_v4 = vmul.f32 %v1285_v23, %v861_v52  ;;  %vm868_vm8 = vweird.f32 %v1285_v23  ;;  %v1287_v5 = vpop.eup %1286 }
 0xa1d   :  { %vm869_vm10 = vmor %vm867_vm9, %vm868_vm8 }
 0xa1e   :  { %v864_v24 = vsub.f32 1.0, %v863_v4 }
 0xa20   :  { %v865_v46 = vmul.f32 %v1285_v23, %v864_v24 }
 0xa22   :  { %v866_v25 = vadd.f32 %v1285_v23, %v865_v46 }
 0xa24   :  { %v870_v26 = vsel %vm869_vm10, %v1285_v23, %v866_v25 }
 0xa25   :  { %v875_v27 = vsel %vm872_vm11, %v874_v51, %v870_v26 }
 0xa26   :  { %v877_v7 = vsel %vm1620_vm6, %v1287_v5, %v875_v27 }
 0xa27   :  { %880 = vrot.lane.b32.xlu1 %v877_v7, %s1482_s3  ;;  %v878_v63 = vmul.f32 %v877_v7, %v1774_v11 }
 0xa2d   :  { %v769_v30 = vpop.f32.mrf.mxu2 }
 0xa2e   :  { %v795_v31 = vadd.f32 %v794_v28, %v769_v30 }
 0xa30   :  { %v797_v32 = vadd.f32 %v1687_v0, %v795_v31 }
 0xa32   :  { %v1201_v33 = vmul.f32 -1.442695, %v797_v32 }
 0xa34   :  { %1288 = vpow2.f32 %v1201_v33 }
 0xa3a   :  { %v1289_v34 = vpop.eup %1288 }
 0xa3b   :  { %v802_v35 = vadd.f32 1.0, %v1289_v34 }
 0xa3d   :  { %1290 = vrcp.f32 %v802_v35  ;;  %v814_v39 = vand.u32 2147483648, %v802_v35  ;;  %v812_v41 = vand.u32 2147483647, %v802_v35  ;;  %vm808_vm13 = vweird.f32 %v802_v35 }
 0xa3e   :  { %1292 = vtanh.f32 %v797_v32 }
 0xa3f   :  { %v815_v50 = vor.u32 1.1754944e-38, %v814_v39  ;;  %vm813_vm15 = vcmp.eq.f32.partialorder %v812_v41, 8.507059e+37 }
 0xa43   :  { %v1291_v36 = vpop.eup %1290 }
 0xa44   :  { %v804_v37 = vmul.f32 %v1291_v36, %v802_v35  ;;  %vm809_vm12 = vweird.f32 %v1291_v36  ;;  %v1293_v54 = vpop.eup %1292 }
 0xa45   :  { %vm810_vm14 = vmor %vm808_vm13, %vm809_vm12 }
 0xa46   :  { %v805_v38 = vsub.f32 1.0, %v804_v37 }
 0xa48   :  { %v806_v40 = vmul.f32 %v1291_v36, %v805_v38 }
 0xa4a   :  { %v807_v43 = vadd.f32 %v1291_v36, %v806_v40 }
 0xa4c   :  { %v811_v53 = vsel %vm810_vm14, %v1291_v36, %v807_v43 }
 0xa4d   :  { %v816_v56 = vsel %vm813_vm15, %v815_v50, %v811_v53 }
 0xa4e   :  { %v818_v57 = vsel %vm1620_vm6, %v1293_v54, %v816_v56 }
 0xa4f   :  { %821 = vrot.lane.b32.xlu0 %v818_v57, %s1482_s3  ;;  %v819_v8 = vmul.f32 %v818_v57, %v1779_v55 }
 0xa99   :  { %v881_v58 = vpop.permute.xlu1 %880 }
 0xa9a   :  { %v883_v60 = vmul.f32 %v881_v58, %v877_v7 }
 0xa9c   :  { %885 = vrot.lane.b32.xlu0 %v883_v60, %s1483_s12 }
 0xac1   :  { %v822_v61 = vpop.permute.xlu0 %821 }
 0xac2   :  { %v824_v62 = vmul.f32 %v822_v61, %v818_v57 }
 0xac4   :  { %826 = vrot.lane.b32.xlu2 %v824_v62, %s1483_s12 }
 0xb0e   :  { %v886_v1 = vpop.permute.xlu0 %885 }
 0xb0f   :  { %v1808_v42 = vadd.f32 %v886_v1, %v878_v63 }
 0xb11   :  { %1294 = vtanh.f32 %v1808_v42 }
 0xb17   :  { %v1295_v6 = vpop.eup %1294 }
 0xb18   :  { %891 = vrot.lane.b32.xlu2 %v1295_v6, %s1482_s3 }
 0xb1e   :  { %v827_v10 = vpop.permute.xlu2 %826 }
 0xb1f   :  { %v1813_v59 = vadd.f32 %v827_v10, %v819_v8 }
 0xb21   :  { %1296 = vtanh.f32 %v1813_v59 }
 0xb27   :  { %v1297_v12 = vpop.eup %1296 }
 0xb28   :  { %832 = vrot.lane.b32.xlu1 %v1297_v12, %s1482_s3 }
 0xb72   :  { %v892_v14 = vpop.permute.xlu2 %891 }
 0xb73   :  { %v894_v11 = vmul.f32 %v892_v14, %v877_v7 }
 0xb75   :  { %921 = vrot.lane.b32.xlu1 %v894_v11, %s1483_s12 }
 0xb9a   :  { %v833_v16 = vpop.permute.xlu1 %832 }
 0xb9b   :  { %v835_v3 = vmul.f32 %v833_v16, %v818_v57 }
 0xb9d   :  { %896 = vrot.lane.b32.xlu0 %v835_v3, %s1483_s12 }
 0xbe7   :  { %v922_v55 = vpop.permute.xlu1 %921 }
 0xbe8   :  { %1205 = vmatmul.msk.f32.vlgmr.msra.gmra.mxu3 %vm231_vm1, %v922_v55  ;;  %1207 = vmatmul.msk.f32.vlgmr.msrb.gmra.mxu1 %vm231_vm1, %v922_v55 }
 0xc0f   :  { %v897_v17 = vpop.permute.xlu0 %896 }
 0xc10   :  { %1204 = vmatmul.msk.f32.vlgmr.msra.gmra.mxu2 %vm231_vm1, %v897_v17 }
 0xc65   :  { %v1001_v9 = vpop.f32.mrf.mxu1 }
 0xc66   :  { %v1004_v20 = vadd.f32 %v1001_v9, %v229_v19 }
 0xc68   :  { %v1208_v21 = vmul.f32 -1.442695, %v1004_v20 }
 0xc6a   :  { %1298 = vpow2.f32 %v1208_v21 }
 0xc6b   :  { %v942_v51 = vpop.f32.mrf.mxu3 }
 0xc70   :  { %v1299_v45 = vpop.eup %1298 }
 0xc71   :  { %v1009_v2 = vadd.f32 1.0, %v1299_v45 }
 0xc73   :  { %1300 = vrcp.f32 %v1009_v2  ;;  %v1021_v52 = vand.u32 2147483648, %v1009_v2  ;;  %v1019_v4 = vand.u32 2147483647, %v1009_v2  ;;  %vm1015_vm0 = vweird.f32 %v1009_v2 }
 0xc74   :  { %1302 = vtanh.f32 %v1004_v20 }
 0xc75   :  { %v1022_v44 = vor.u32 1.1754944e-38, %v1021_v52  ;;  %vm1020_vm4 = vcmp.eq.f32.partialorder %v1019_v4, 8.507059e+37 }
 0xc79   :  { %v1301_v47 = vpop.eup %1300 }
 0xc7a   :  { %v1011_v22 = vmul.f32 %v1301_v47, %v1009_v2  ;;  %vm1016_vm2 = vweird.f32 %v1301_v47  ;;  %v1303_v46 = vpop.eup %1302 }
 0xc7b   :  { %vm1017_vm3 = vmor %vm1015_vm0, %vm1016_vm2 }
 0xc7c   :  { %v1012_v49 = vsub.f32 1.0, %v1011_v22 }
 0xc7e   :  { %v1013_v23 = vmul.f32 %v1301_v47, %v1012_v49 }
 0xc80   :  { %v1014_v24 = vadd.f32 %v1301_v47, %v1013_v23 }
 0xc82   :  { %v1018_v13 = vsel %vm1017_vm3, %v1301_v47, %v1014_v24 }
 0xc83   :  { %v1023_v48 = vsel %vm1020_vm4, %v1022_v44, %v1018_v13 }
 0xc84   :  { %v1025_v25 = vsel %vm1620_vm6, %v1303_v46, %v1023_v48 }
 0xc85   :  { %1028 = vrot.lane.b32.xlu0 %v1025_v25, %s1482_s3  ;;  %v1026_v57 = vmul.f32 %v1025_v25, %v1808_v42 }
 0xc93   :  { %v917_v26 = vpop.f32.mrf.mxu2 }
 0xc94   :  { %v943_v5 = vadd.f32 %v942_v51, %v917_v26  ;;  %v1133_v51 = vld [vmem:[%s1876_s9 + $0x8] sm:$0xff]  ;;  %v1132_v26 = vld [vmem:[%s1876_s9] sm:$0xff] }
 0xc96   :  { %v945_v27 = vadd.f32 %v1687_v0, %v943_v5 }
 0xc98   :  { %v1206_v7 = vmul.f32 -1.442695, %v945_v27 }
 0xc9a   :  { %1304 = vpow2.f32 %v1206_v7 }
 0xca0   :  { %v1305_v28 = vpop.eup %1304 }
 0xca1   :  { %v950_v30 = vadd.f32 1.0, %v1305_v28  ;;  %v1225_v28 = vld [vmem:[%s1877_s10] ss:$0 sm:$0xff] }
 0xca3   :  { %1306 = vrcp.f32 %v950_v30  ;;  %v962_v34 = vand.u32 2147483648, %v950_v30  ;;  %v960_v36 = vand.u32 2147483647, %v950_v30  ;;  %vm956_vm7 = vweird.f32 %v950_v30 }
 0xca4   :  { %1308 = vtanh.f32 %v945_v27 }
 0xca5   :  { %v963_v38 = vor.u32 1.1754944e-38, %v962_v34  ;;  %vm961_vm9 = vcmp.eq.f32.partialorder %v960_v36, 8.507059e+37 }
 0xca9   :  { %v1307_v31 = vpop.eup %1306 }
 0xcaa   :  { %v952_v32 = vmul.f32 %v1307_v31, %v950_v30  ;;  %vm957_vm5 = vweird.f32 %v1307_v31  ;;  %v1309_v40 = vpop.eup %1308 }
 0xcab   :  { %vm958_vm8 = vmor %vm956_vm7, %vm957_vm5 }
 0xcac   :  { %v953_v33 = vsub.f32 1.0, %v952_v32 }
 0xcae   :  { %v954_v35 = vmul.f32 %v1307_v31, %v953_v33 }
 0xcb0   :  { %v955_v37 = vadd.f32 %v1307_v31, %v954_v35 }
 0xcb2   :  { %v959_v39 = vsel %vm958_vm8, %v1307_v31, %v955_v37 }
 0xcb3   :  { %v964_v41 = vsel %vm961_vm9, %v963_v38, %v959_v39 }
 0xcb4   :  { %v966_v43 = vsel %vm1620_vm6, %v1309_v40, %v964_v41 }
 0xcb5   :  { %969 = vrot.lane.b32.xlu2 %v966_v43, %s1482_s3  ;;  %v967_v62 = vmul.f32 %v966_v43, %v1813_v59 }
 0xcf7   :  { %v1029_v50 = vpop.permute.xlu0 %1028 }
 0xcf8   :  { %v1031_v53 = vmul.f32 %v1029_v50, %v1025_v25 }
 0xcfa   :  { %1033 = vrot.lane.b32.xlu2 %v1031_v53, %s1483_s12 }
 0xd0f   :  { %v970_v54 = vpop.permute.xlu2 %969 }
 0xd10   :  { %v972_v56 = vmul.f32 %v970_v54, %v966_v43 }
 0xd12   :  { %974 = vrot.lane.b32.xlu1 %v972_v56, %s1483_s12 }
 0xd54   :  { %v1034_v58 = vpop.permute.xlu2 %1033 }
 0xd55   :  { %v1036_v60 = vadd.f32 %v1034_v58, %v1026_v57 }
 0xd57   :  { %1310 = vtanh.f32 %v1036_v60 }
 0xd5d   :  { %v1311_v61 = vpop.eup %1310 }
 0xd5e   :  { %1039 = vrot.lane.b32.xlu1 %v1311_v61, %s1482_s3 }
 0xd84   :  { %v975_v63 = vpop.permute.xlu1 %974 }
 0xd85   :  { %v977_v1 = vadd.f32 %v975_v63, %v967_v62 }
 0xd87   :  { %1312 = vtanh.f32 %v977_v1 }
 0xd8d   :  { %v1313_v6 = vpop.eup %1312 }
 0xd8e   :  { %980 = vrot.lane.b32.xlu0 %v1313_v6, %s1482_s3 }
 0xdd0   :  { %v1040_v8 = vpop.permute.xlu1 %1039 }
 0xdd1   :  { %v1042_v10 = vmul.f32 %v1040_v8, %v1025_v25  ;;  %v1135_v25 = vld [vmem:[%s1876_s9 + $0x18] sm:$0xff] }
 0xdd2   :  { %1157 = vmatpush.msra.mxu1 %v1135_v25 }
 0xdd3   :  { %1069 = vrot.lane.b32.xlu0 %v1042_v10, %s1483_s12 }
 0xdd4   :  { %1158 = vmatpush.msra.mxu1 %v1134_v29 }
 0xdd6   :  { %1159 = vmatpush.msra.mxu1 %v1133_v51 }
 0xdd8   :  { %1160 = vmatpush.msra.mxu1 %v1132_v26 }
 0xe00   :  { %v981_v12 = vpop.permute.xlu0 %980 }
 0xe01   :  { %v983_v42 = vmul.f32 %v981_v12, %v966_v43 }
 0xe03   :  { %1044 = vrot.lane.b32.xlu2 %v983_v42, %s1483_s12 }
 0xe45   :  { %v1070_v14 = vpop.permute.xlu0 %1069 }
 0xe46   :  { %1210 = vmatmul.msk.f32.vlgmr.msrb.gmra.mxu3 %vm231_vm1, %v1070_v14 }
 0xe5d   :  { %v1045_v11 = vpop.permute.xlu2 %1044 }
 0xe5e   :  { %1209 = vmatmul.msk.f32.vlgmr.msrb.gmra.mxu2 %vm231_vm1, %v1045_v11 }
 0xec9   :  { %v1090_v59 = vpop.f32.mrf.mxu3 }
 0xee1   :  { %v1065_v15 = vpop.f32.mrf.mxu2 }
 0xee2   :  { %v1091_v16 = vadd.f32 %v1090_v59, %v1065_v15 }
 0xee4   :  { %v1093_v3 = vadd.f32 %v1687_v0, %v1091_v16 }
 0xee6   :  { %v1211_v55 = vmul.f32 -1.442695, %v1093_v3 }
 0xee8   :  { %1314 = vpow2.f32 %v1211_v55 }
 0xeee   :  { %v1315_v17 = vpop.eup %1314 }
 0xeef   :  { %v1098_v18 = vadd.f32 1.0, %v1315_v17 }
 0xef1   :  { %1316 = vrcp.f32 %v1098_v18  ;;  %v1110_v21 = vand.u32 2147483648, %v1098_v18  ;;  %v1108_v2 = vand.u32 2147483647, %v1098_v18  ;;  %vm1104_vm11 = vweird.f32 %v1098_v18 }
 0xef2   :  { %1318 = vtanh.f32 %v1093_v3 }
 0xef3   :  { %v1111_v22 = vor.u32 1.1754944e-38, %v1110_v21  ;;  %vm1109_vm13 = vcmp.eq.f32.partialorder %v1108_v2, 8.507059e+37 }
 0xef7   :  { %v1317_v19 = vpop.eup %1316 }
 0xef8   :  { %v1100_v9 = vmul.f32 %v1317_v19, %v1098_v18  ;;  %vm1105_vm10 = vweird.f32 %v1317_v19  ;;  %v1319_v0 = vpop.eup %1318 }
 0xef9   :  { %vm1106_vm12 = vmor %vm1104_vm11, %vm1105_vm10 }
 0xefa   :  { %v1101_v20 = vsub.f32 1.0, %v1100_v9 }
 0xefc   :  { %v1102_v45 = vmul.f32 %v1317_v19, %v1101_v20 }
 0xefe   :  { %v1103_v47 = vadd.f32 %v1317_v19, %v1102_v45 }
 0xf00   :  { %v1107_v49 = vsel %vm1106_vm12, %v1317_v19, %v1103_v47 }
 0xf01   :  { %v1112_v52 = vsel %vm1109_vm13, %v1111_v22, %v1107_v49 }
 0xf02   :  { %v1114_v23 = vsel %vm1620_vm6, %v1319_v0, %v1112_v52  ;;  %vm1165_vm6 = vcmask 31744  }
 0xf03   :  { %1117 = vrot.lane.b32.xlu1 %v1114_v23, %s1482_s3  ;;  %v1115_v44 = vmul.f32 %v1114_v23, %v977_v1 }
 0xf75   :  { %v1118_v4 = vpop.permute.xlu1 %1117 }
 0xf76   :  { %v1120_v24 = vmul.f32 %v1118_v4, %v1114_v23 }
 0xf78   :  { %1122 = vrot.lane.b32.xlu2 %v1120_v24, %s1483_s12 }
 0xfd2   :  { %v1123_v13 = vpop.permute.xlu2 %1122 }
 0xfd3   :  { %v1125_v46 = vadd.f32 %v1123_v13, %v1115_v44 }
 0xfd5   :  { %1320 = vtanh.f32 %v1125_v46 }
 0xfdb   :  { %v1321_v48 = vpop.eup %1320 }
 0xfdc   :  { %1128 = vrot.lane.b32.xlu0 %v1321_v48, %s1482_s3 }
0x104e   :  { %v1129_v5 = vpop.permute.xlu0 %1128 }
0x104f   :  { %v1131_v27 = vmul.f32 %v1129_v5, %v1114_v23 }
0x1051   :  { %1141 = vrot.lane.b32.xlu1 %v1131_v27, %s1483_s12 }
0x10c3   :  { %v1142_v7 = vpop.permute.xlu1 %1141 }
0x10c4   :  { %1212 = vmatmul.msk.f32.vlgmr.msra.gmra.mxu1 %vm231_vm1, %v1142_v7 }
0x1141   :  { %v1162_v30 = vpop.f32.mrf.mxu1 }
0x1142   :  { %v1163_v31 = vadd.f32 %v1225_v28, %v1162_v30 }
0x1144   :  { %1166 = vst.msk [vmem:[%s1878_s11] sm:$0xff] %vm1165_vm6, %v1163_v31 }
0x1145   :  { %1171 = vsyncpa [#allocation3], 1 }
0x1146   :  { %1172 = vsyncpa [#allocation5], 1 }
0x1147   :  { %1173 = vsyncpa [#allocation8], 1 }
0x1148   :  { %1174 = vsyncpa [#allocation11], 1 }

</bundles_post_ra>
